<compile_context>
chip_gen: v7x
topology: tpu7x:2x2x1
jax: 0.10.0
libtpu: 0.0.40
codegen_flags: <defaults>
</compile_context>

<pallas_src>
import functools

import jax
import jax.numpy as jnp
import numpy as np
from jax.experimental import pallas as pl
from jax.experimental.pallas import tpu as pltpu


def _make_kernel(n_layers, seq_len, batch, hidden_dim, input_dim, d_pad):
    T, B, H, D = seq_len, batch, hidden_dim, input_dim
    R = d_pad + H  # rows per layer slot in the packed weight slab

    def kernel(x_ref, w_ref, b_ref, out_ref, act_ref):
        # x_ref:   (T*B, D)              bf16  time-major flattened input
        # w_ref:   ((n_layers+1)*R, 3H)  bf16  packed weight slab (see header)
        # b_ref:   (n_layers+1, 4H)      f32   packed bias slab
        # out_ref: (B, T*H)              f32   lane-dense output (row b = y_0[b] | ... | y_{T-1}[b])
        # act_ref: (T*B, H)              bf16  VMEM scratch: time-major per-layer hidden states
        for l in range(n_layers):
            d_in = D if l == 0 else H
            base = l * R
            w_ih = w_ref[base:base + d_in, :]               # (d_in, 3H) bf16
            w_hh = w_ref[base + d_pad:base + d_pad + H, :]  # (H, 3H)    bf16
            b_l = b_ref[l:l + 1, :]                         # (1, 4H)    f32
            gi_b = b_l[:, 0:3 * H]                          # (1, 3H)  [b_ir+b_hr | b_iz+b_hz | b_in]
            b_hn = jnp.broadcast_to(b_l[:, 3 * H:4 * H], (B, H))   # hoisted out of the time loop

            inp = x_ref[...] if l == 0 else act_ref[...]    # (T*B, d_in) bf16

            # Input->hidden projection for ALL timesteps and ALL gates as ONE bf16 matmul
            # (f32 accumulation); only h @ W_hh remains on the serial critical path.
            gi = jnp.dot(inp, w_ih, preferred_element_type=jnp.float32) + gi_b   # (T*B, 3H) f32

            h = jnp.zeros((B, H), jnp.float32)
            for t in range(T):                               # static unroll; T is small
                lo = t * B
                # Single fused recurrent matmul per step; gates via static lane slices.
                gh = jnp.dot(h.astype(jnp.bfloat16), w_hh,
                             preferred_element_type=jnp.float32)                 # (B, 3H) f32
                gi_t = gi[lo:lo + B, :]
                r = jax.nn.sigmoid(gi_t[:, 0:H] + gh[:, 0:H])
                z = jax.nn.sigmoid(gi_t[:, H:2 * H] + gh[:, H:2 * H])
                n = jnp.tanh(gi_t[:, 2 * H:3 * H] + r * (gh[:, 2 * H:3 * H] + b_hn))
                h = (1.0 - z) * n + z * h
                act_ref[lo:lo + B, :] = h.astype(act_ref.dtype)  # direct scratch store, no concat

        # TODO(synk): if profiling (post operand-packing) shows the serial chain dominates,
        #             wavefront the layers (start layer l+1 step t once layer l's h_t exists).

        # Output projection (+ sigmoid) for all timesteps at once.
        fcb = n_layers * R
        w_fc = w_ref[fcb:fcb + H, 0:H]                      # (H, H) bf16
        b_fc = b_ref[n_layers:n_layers + 1, 0:H]            # (1, H) f32
        y = jax.nn.sigmoid(
            jnp.dot(act_ref[...], w_fc, preferred_element_type=jnp.float32) + b_fc
        )                                                    # (T*B, H) f32

        # Lane-dense stores: out[b, t*H:(t+1)*H] = y_t[b, :] (wrapper reshape is then free).
        for t in range(T):
            out_ref[:, t * H:(t + 1) * H] = y[t * B:(t + 1) * B, :].astype(out_ref.dtype)

    return kernel


def embedder_forward(x, params, hidden_dim, n_layers):
    """x: (B, T, input_dim) float32 (batch_first, like torch). Returns (B, T, hidden_dim)."""
    B, T, D = x.shape
    H = hidden_dim
    d_pad = max(D, H)
    R = d_pad + H

    # Time-major flatten so each layer's input projection is one (T*B, D_l) matmul.
    x_tm = jnp.transpose(x, (1, 0, 2)).reshape(T * B, D).astype(jnp.bfloat16)

    # ---- Pack 4*n_layers + 2 parameter tensors into TWO slabs (3 kernel operands total). ----
    w_slab = jnp.zeros(((n_layers + 1) * R, 3 * H), jnp.float32)
    b_slab = jnp.zeros((n_layers + 1, 4 * H), jnp.float32)
    for l in range(n_layers):
        d_in = D if l == 0 else H
        w_ih = params[f"w_ih_{l}"]   # (d_in, 3H), fused gate order (r, z, n) like torch
        w_hh = params[f"w_hh_{l}"]   # (H, 3H)
        b_ih = params[f"b_ih_{l}"]   # (1, 3H)
        b_hh = params[f"b_hh_{l}"]   # (1, 3H)
        base = l * R
        w_slab = w_slab.at[base:base + d_in, :].set(w_ih)
        w_slab = w_slab.at[base + d_pad:base + d_pad + H, :].set(w_hh)
        # Pre-sum r/z biases; b_hn must stay separate (lives inside r*(h W_hn + b_hn)).
        b_slab = b_slab.at[l, 0:2 * H].set(b_ih[0, 0:2 * H] + b_hh[0, 0:2 * H])
        b_slab = b_slab.at[l, 2 * H:3 * H].set(b_ih[0, 2 * H:3 * H])
        b_slab = b_slab.at[l, 3 * H:4 * H].set(b_hh[0, 2 * H:3 * H])
    fcb = n_layers * R
    w_slab = w_slab.at[fcb:fcb + H, 0:H].set(params["w_fc"])
    b_slab = b_slab.at[n_layers, 0:H].set(params["b_fc"][0])
    w_slab = w_slab.astype(jnp.bfloat16)   # bf16 MXU operands; biases/gate math stay f32

    # Single invocation, no grid: every operand is a whole-array VMEM block (< ~60 KB total).
    # TODO(synk): for real batch sizes on v7x, add a leading "parallel" batch grid axis to use
    #             both TensorCores and re-budget activation VMEM against its 64 MiB.
    out_flat = pl.pallas_call(
        _make_kernel(n_layers, T, B, H, D, d_pad),
        out_shape=jax.ShapeDtypeStruct((B, T * H), jnp.float32),
        in_specs=[pl.BlockSpec(memory_space=pltpu.MemorySpace.VMEM)] * 3,
        out_specs=pl.BlockSpec(memory_space=pltpu.MemorySpace.VMEM),
        scratch_shapes=[pltpu.VMEM((T * B, H), jnp.bfloat16)],
    )(x_tm, w_slab, b_slab)

    return out_flat.reshape(B, T, H)   # free row-major reshape, no transpose needed


def init_params(key, input_dim, hidden_dim, n_layers):
    """Deterministic params; (x @ W)-layout weights matching torch.nn.GRU/Linear shapes.

    Biases are kept as (1, 3H) / (1, H) row vectors so they broadcast against (rows, H).
    """
    H = hidden_dim
    params = {}
    bound = 1.0 / np.sqrt(H)
    for l in range(n_layers):
        d_in = input_dim if l == 0 else H
        key, k1, k2, k3, k4 = jax.random.split(key, 5)
        params[f"w_ih_{l}"] = jax.random.uniform(k1, (d_in, 3 * H), jnp.float32, -bound, bound)
        params[f"w_hh_{l}"] = jax.random.uniform(k2, (H, 3 * H), jnp.float32, -bound, bound)
        params[f"b_ih_{l}"] = jax.random.uniform(k3, (1, 3 * H), jnp.float32, -bound, bound)
        params[f"b_hh_{l}"] = jax.random.uniform(k4, (1, 3 * H), jnp.float32, -bound, bound)
    key, k1, k2 = jax.random.split(key, 3)
    params["w_fc"] = jax.random.uniform(k1, (H, H), jnp.float32, -bound, bound)
    params["b_fc"] = jax.random.uniform(k2, (1, H), jnp.float32, -bound, bound)
    return params


def ref_forward(x, params, hidden_dim, n_layers):
    """Pure-JAX f32 reference (mirrors torch.nn.GRU + Linear + sigmoid)."""
    B, T, _ = x.shape
    H = hidden_dim
    inp = x
    for l in range(n_layers):
        w_ih = params[f"w_ih_{l}"]
        w_hh = params[f"w_hh_{l}"]
        b_ih = params[f"b_ih_{l}"]
        b_hh = params[f"b_hh_{l}"]

        def step(h, x_t):
            gi = x_t @ w_ih + b_ih
            gh = h @ w_hh + b_hh
            r = jax.nn.sigmoid(gi[:, :H] + gh[:, :H])
            z = jax.nn.sigmoid(gi[:, H:2 * H] + gh[:, H:2 * H])
            n = jnp.tanh(gi[:, 2 * H:] + r * gh[:, 2 * H:])
            h_new = (1.0 - z) * n + z * h
            return h_new, h_new

        h0 = jnp.zeros((B, H), jnp.float32)
        _, outs = jax.lax.scan(step, h0, jnp.transpose(inp, (1, 0, 2)))
        inp = jnp.transpose(outs, (1, 0, 2))
    return jax.nn.sigmoid(inp @ params["w_fc"] + params["b_fc"])


if __name__ == "__main__":
    # Embedder(input_dim, hidden_dim, n_layers); forward input x: (batch, seq, input_dim)
    batch, seq, input_dim, hidden_dim, n_layers = 4, 8, 8, 32, 2

    key = jax.random.PRNGKey(0)
    key, kx = jax.random.split(key)
    x = jax.random.normal(kx, (batch, seq, input_dim), jnp.float32)

    params = init_params(key, input_dim, hidden_dim, n_layers)

    fwd = jax.jit(functools.partial(embedder_forward,
                                    hidden_dim=hidden_dim, n_layers=n_layers))
    out = fwd(x, params)
    out = jax.block_until_ready(out)

    ref = ref_forward(x, params, hidden_dim, n_layers)
    # Tolerance relaxed vs. the f32 reference because matmul operands are bf16 (f32 accumulation).
    np.testing.assert_allclose(np.asarray(out), np.asarray(ref), rtol=0.0, atol=5e-2)
    assert out.shape == (batch, seq, hidden_dim)

    print("KERNEL_OK")
</pallas_src>

<mosaic_0001>
module attributes {stable_mosaic.version = 11 : i64} {
  func.func @kernel(%arg0: memref<32x8xbf16, #tpu.memory_space<vmem>>, %arg1: memref<192x96xbf16, #tpu.memory_space<vmem>>, %arg2: memref<3x128xf32, #tpu.memory_space<vmem>>, %arg3: memref<4x256xf32, #tpu.memory_space<vmem>>, %arg4: memref<32x32xbf16, #tpu.memory_space<vmem>>) attributes {dimension_semantics = [], scalar_prefetch = 0 : i64, scratch_operands = 1 : i64, tpu.core_type = #tpu.core_type<tc>} {
    %c0 = arith.constant 0 : index
    %c0_0 = arith.constant 0 : index
    %0 = vector.load %arg1[%c0, %c0_0] : memref<192x96xbf16, #tpu.memory_space<vmem>>, vector<8x96xbf16>
    %c32 = arith.constant 32 : index
    %c0_1 = arith.constant 0 : index
    %1 = vector.load %arg1[%c32, %c0_1] : memref<192x96xbf16, #tpu.memory_space<vmem>>, vector<32x96xbf16>
    %c0_2 = arith.constant 0 : index
    %c0_3 = arith.constant 0 : index
    %2 = vector.load %arg2[%c0_2, %c0_3] : memref<3x128xf32, #tpu.memory_space<vmem>>, vector<1x128xf32>
    %3 = vector.extract_strided_slice %2 {offsets = [0, 0], sizes = [1, 96], strides = [1, 1]} : vector<1x128xf32> to vector<1x96xf32>
    %4 = vector.extract_strided_slice %2 {offsets = [0, 96], sizes = [1, 32], strides = [1, 1]} : vector<1x128xf32> to vector<1x32xf32>
    %5 = vector.shape_cast %4 : vector<1x32xf32> to vector<1x32xf32>
    %6 = vector.broadcast %5 : vector<1x32xf32> to vector<4x32xf32>
    %c0_4 = arith.constant 0 : index
    %c0_5 = arith.constant 0 : index
    %7 = vector.load %arg0[%c0_4, %c0_5] : memref<32x8xbf16, #tpu.memory_space<vmem>>, vector<32x8xbf16>
    %cst = arith.constant dense<0.000000e+00> : vector<32x96xf32>
    %8 = tpu.matmul %7, %0, %cst {dimension_numbers = #tpu.dot_dimension_numbers<[1], [0], [0], [1], [0, 0, 1, 1], [], []>} : vector<32x8xbf16>, vector<8x96xbf16>, vector<32x96xf32> -> vector<32x96xf32>
    %9 = vector.broadcast %3 : vector<1x96xf32> to vector<32x96xf32>
    %10 = arith.addf %8, %9 : vector<32x96xf32>
    %cst_6 = arith.constant 0.000000e+00 : f32
    %11 = vector.broadcast %cst_6 : f32 to vector<4x32xf32>
    %12 = arith.truncf %11 : vector<4x32xf32> to vector<4x32xbf16>
    %cst_7 = arith.constant dense<0.000000e+00> : vector<4x96xf32>
    %13 = tpu.matmul %12, %1, %cst_7 {dimension_numbers = #tpu.dot_dimension_numbers<[1], [0], [0], [1], [0, 0, 1, 1], [], []>} : vector<4x32xbf16>, vector<32x96xbf16>, vector<4x96xf32> -> vector<4x96xf32>
    %14 = vector.extract_strided_slice %10 {offsets = [0, 0], sizes = [4, 96], strides = [1, 1]} : vector<32x96xf32> to vector<4x96xf32>
    %15 = vector.extract_strided_slice %14 {offsets = [0, 0], sizes = [4, 32], strides = [1, 1]} : vector<4x96xf32> to vector<4x32xf32>
    %16 = vector.extract_strided_slice %13 {offsets = [0, 0], sizes = [4, 32], strides = [1, 1]} : vector<4x96xf32> to vector<4x32xf32>
    %17 = arith.addf %15, %16 : vector<4x32xf32>
    %18 = arith.negf %17 : vector<4x32xf32>
    %19 = math.exp %18 : vector<4x32xf32>
    %cst_8 = arith.constant 1.000000e+00 : f32
    %20 = vector.broadcast %cst_8 : f32 to vector<4x32xf32>
    %21 = arith.addf %20, %19 : vector<4x32xf32>
    %22 = arith.divf %20, %21 : vector<4x32xf32>
    %23 = vector.extract_strided_slice %14 {offsets = [0, 32], sizes = [4, 32], strides = [1, 1]} : vector<4x96xf32> to vector<4x32xf32>
    %24 = vector.extract_strided_slice %13 {offsets = [0, 32], sizes = [4, 32], strides = [1, 1]} : vector<4x96xf32> to vector<4x32xf32>
    %25 = arith.addf %23, %24 : vector<4x32xf32>
    %26 = arith.negf %25 : vector<4x32xf32>
    %27 = math.exp %26 : vector<4x32xf32>
    %cst_9 = arith.constant 1.000000e+00 : f32
    %28 = vector.broadcast %cst_9 : f32 to vector<4x32xf32>
    %29 = arith.addf %28, %27 : vector<4x32xf32>
    %30 = arith.divf %28, %29 : vector<4x32xf32>
    %31 = vector.extract_strided_slice %14 {offsets = [0, 64], sizes = [4, 32], strides = [1, 1]} : vector<4x96xf32> to vector<4x32xf32>
    %32 = vector.extract_strided_slice %13 {offsets = [0, 64], sizes = [4, 32], strides = [1, 1]} : vector<4x96xf32> to vector<4x32xf32>
    %33 = arith.addf %32, %6 : vector<4x32xf32>
    %34 = arith.mulf %22, %33 : vector<4x32xf32>
    %35 = arith.addf %31, %34 : vector<4x32xf32>
    %36 = math.tanh %35 : vector<4x32xf32>
    %cst_10 = arith.constant 1.000000e+00 : f32
    %37 = vector.broadcast %cst_10 : f32 to vector<4x32xf32>
    %38 = arith.subf %37, %30 : vector<4x32xf32>
    %39 = arith.mulf %38, %36 : vector<4x32xf32>
    %40 = arith.mulf %30, %11 : vector<4x32xf32>
    %41 = arith.addf %39, %40 : vector<4x32xf32>
    %42 = arith.truncf %41 : vector<4x32xf32> to vector<4x32xbf16>
    %c0_11 = arith.constant 0 : index
    %c0_12 = arith.constant 0 : index
    %43 = vector.load %arg4[%c0_11, %c0_12] : memref<32x32xbf16, #tpu.memory_space<vmem>>, vector<4x32xbf16>
    tpu.vector_store %arg4[%c0_11, %c0_12], %42 {strides = array<i32>} : memref<32x32xbf16, #tpu.memory_space<vmem>>, vector<4x32xbf16>,
    %44 = arith.truncf %41 : vector<4x32xf32> to vector<4x32xbf16>
    %cst_13 = arith.constant dense<0.000000e+00> : vector<4x96xf32>
    %45 = tpu.matmul %44, %1, %cst_13 {dimension_numbers = #tpu.dot_dimension_numbers<[1], [0], [0], [1], [0, 0, 1, 1], [], []>} : vector<4x32xbf16>, vector<32x96xbf16>, vector<4x96xf32> -> vector<4x96xf32>
    %46 = vector.extract_strided_slice %10 {offsets = [4, 0], sizes = [4, 96], strides = [1, 1]} : vector<32x96xf32> to vector<4x96xf32>
    %47 = vector.extract_strided_slice %46 {offsets = [0, 0], sizes = [4, 32], strides = [1, 1]} : vector<4x96xf32> to vector<4x32xf32>
    %48 = vector.extract_strided_slice %45 {offsets = [0, 0], sizes = [4, 32], strides = [1, 1]} : vector<4x96xf32> to vector<4x32xf32>
    %49 = arith.addf %47, %48 : vector<4x32xf32>
    %50 = arith.negf %49 : vector<4x32xf32>
    %51 = math.exp %50 : vector<4x32xf32>
    %cst_14 = arith.constant 1.000000e+00 : f32
    %52 = vector.broadcast %cst_14 : f32 to vector<4x32xf32>
    %53 = arith.addf %52, %51 : vector<4x32xf32>
    %54 = arith.divf %52, %53 : vector<4x32xf32>
    %55 = vector.extract_strided_slice %46 {offsets = [0, 32], sizes = [4, 32], strides = [1, 1]} : vector<4x96xf32> to vector<4x32xf32>
    %56 = vector.extract_strided_slice %45 {offsets = [0, 32], sizes = [4, 32], strides = [1, 1]} : vector<4x96xf32> to vector<4x32xf32>
    %57 = arith.addf %55, %56 : vector<4x32xf32>
    %58 = arith.negf %57 : vector<4x32xf32>
    %59 = math.exp %58 : vector<4x32xf32>
    %cst_15 = arith.constant 1.000000e+00 : f32
    %60 = vector.broadcast %cst_15 : f32 to vector<4x32xf32>
    %61 = arith.addf %60, %59 : vector<4x32xf32>
    %62 = arith.divf %60, %61 : vector<4x32xf32>
    %63 = vector.extract_strided_slice %46 {offsets = [0, 64], sizes = [4, 32], strides = [1, 1]} : vector<4x96xf32> to vector<4x32xf32>
    %64 = vector.extract_strided_slice %45 {offsets = [0, 64], sizes = [4, 32], strides = [1, 1]} : vector<4x96xf32> to vector<4x32xf32>
    %65 = arith.addf %64, %6 : vector<4x32xf32>
    %66 = arith.mulf %54, %65 : vector<4x32xf32>
    %67 = arith.addf %63, %66 : vector<4x32xf32>
    %68 = math.tanh %67 : vector<4x32xf32>
    %cst_16 = arith.constant 1.000000e+00 : f32
    %69 = vector.broadcast %cst_16 : f32 to vector<4x32xf32>
    %70 = arith.subf %69, %62 : vector<4x32xf32>
    %71 = arith.mulf %70, %68 : vector<4x32xf32>
    %72 = arith.mulf %62, %41 : vector<4x32xf32>
    %73 = arith.addf %71, %72 : vector<4x32xf32>
    %74 = arith.truncf %73 : vector<4x32xf32> to vector<4x32xbf16>
    %c4 = arith.constant 4 : index
    %c0_17 = arith.constant 0 : index
    %75 = vector.load %arg4[%c4, %c0_17] : memref<32x32xbf16, #tpu.memory_space<vmem>>, vector<4x32xbf16>
    tpu.vector_store %arg4[%c4, %c0_17], %74 {strides = array<i32>} : memref<32x32xbf16, #tpu.memory_space<vmem>>, vector<4x32xbf16>,
    %76 = arith.truncf %73 : vector<4x32xf32> to vector<4x32xbf16>
    %cst_18 = arith.constant dense<0.000000e+00> : vector<4x96xf32>
    %77 = tpu.matmul %76, %1, %cst_18 {dimension_numbers = #tpu.dot_dimension_numbers<[1], [0], [0], [1], [0, 0, 1, 1], [], []>} : vector<4x32xbf16>, vector<32x96xbf16>, vector<4x96xf32> -> vector<4x96xf32>
    %78 = vector.extract_strided_slice %10 {offsets = [8, 0], sizes = [4, 96], strides = [1, 1]} : vector<32x96xf32> to vector<4x96xf32>
    %79 = vector.extract_strided_slice %78 {offsets = [0, 0], sizes = [4, 32], strides = [1, 1]} : vector<4x96xf32> to vector<4x32xf32>
    %80 = vector.extract_strided_slice %77 {offsets = [0, 0], sizes = [4, 32], strides = [1, 1]} : vector<4x96xf32> to vector<4x32xf32>
    %81 = arith.addf %79, %80 : vector<4x32xf32>
    %82 = arith.negf %81 : vector<4x32xf32>
    %83 = math.exp %82 : vector<4x32xf32>
    %cst_19 = arith.constant 1.000000e+00 : f32
    %84 = vector.broadcast %cst_19 : f32 to vector<4x32xf32>
    %85 = arith.addf %84, %83 : vector<4x32xf32>
    %86 = arith.divf %84, %85 : vector<4x32xf32>
    %87 = vector.extract_strided_slice %78 {offsets = [0, 32], sizes = [4, 32], strides = [1, 1]} : vector<4x96xf32> to vector<4x32xf32>
    %88 = vector.extract_strided_slice %77 {offsets = [0, 32], sizes = [4, 32], strides = [1, 1]} : vector<4x96xf32> to vector<4x32xf32>
    %89 = arith.addf %87, %88 : vector<4x32xf32>
    %90 = arith.negf %89 : vector<4x32xf32>
    %91 = math.exp %90 : vector<4x32xf32>
    %cst_20 = arith.constant 1.000000e+00 : f32
    %92 = vector.broadcast %cst_20 : f32 to vector<4x32xf32>
    %93 = arith.addf %92, %91 : vector<4x32xf32>
    %94 = arith.divf %92, %93 : vector<4x32xf32>
    %95 = vector.extract_strided_slice %78 {offsets = [0, 64], sizes = [4, 32], strides = [1, 1]} : vector<4x96xf32> to vector<4x32xf32>
    %96 = vector.extract_strided_slice %77 {offsets = [0, 64], sizes = [4, 32], strides = [1, 1]} : vector<4x96xf32> to vector<4x32xf32>
    %97 = arith.addf %96, %6 : vector<4x32xf32>
    %98 = arith.mulf %86, %97 : vector<4x32xf32>
    %99 = arith.addf %95, %98 : vector<4x32xf32>
    %100 = math.tanh %99 : vector<4x32xf32>
    %cst_21 = arith.constant 1.000000e+00 : f32
    %101 = vector.broadcast %cst_21 : f32 to vector<4x32xf32>
    %102 = arith.subf %101, %94 : vector<4x32xf32>
    %103 = arith.mulf %102, %100 : vector<4x32xf32>
    %104 = arith.mulf %94, %73 : vector<4x32xf32>
    %105 = arith.addf %103, %104 : vector<4x32xf32>
    %106 = arith.truncf %105 : vector<4x32xf32> to vector<4x32xbf16>
    %c8 = arith.constant 8 : index
    %c0_22 = arith.constant 0 : index
    %107 = vector.load %arg4[%c8, %c0_22] : memref<32x32xbf16, #tpu.memory_space<vmem>>, vector<4x32xbf16>
    tpu.vector_store %arg4[%c8, %c0_22], %106 {strides = array<i32>} : memref<32x32xbf16, #tpu.memory_space<vmem>>, vector<4x32xbf16>,
    %108 = arith.truncf %105 : vector<4x32xf32> to vector<4x32xbf16>
    %cst_23 = arith.constant dense<0.000000e+00> : vector<4x96xf32>
    %109 = tpu.matmul %108, %1, %cst_23 {dimension_numbers = #tpu.dot_dimension_numbers<[1], [0], [0], [1], [0, 0, 1, 1], [], []>} : vector<4x32xbf16>, vector<32x96xbf16>, vector<4x96xf32> -> vector<4x96xf32>
    %110 = vector.extract_strided_slice %10 {offsets = [12, 0], sizes = [4, 96], strides = [1, 1]} : vector<32x96xf32> to vector<4x96xf32>
    %111 = vector.extract_strided_slice %110 {offsets = [0, 0], sizes = [4, 32], strides = [1, 1]} : vector<4x96xf32> to vector<4x32xf32>
    %112 = vector.extract_strided_slice %109 {offsets = [0, 0], sizes = [4, 32], strides = [1, 1]} : vector<4x96xf32> to vector<4x32xf32>
    %113 = arith.addf %111, %112 : vector<4x32xf32>
    %114 = arith.negf %113 : vector<4x32xf32>
    %115 = math.exp %114 : vector<4x32xf32>
    %cst_24 = arith.constant 1.000000e+00 : f32
    %116 = vector.broadcast %cst_24 : f32 to vector<4x32xf32>
    %117 = arith.addf %116, %115 : vector<4x32xf32>
    %118 = arith.divf %116, %117 : vector<4x32xf32>
    %119 = vector.extract_strided_slice %110 {offsets = [0, 32], sizes = [4, 32], strides = [1, 1]} : vector<4x96xf32> to vector<4x32xf32>
    %120 = vector.extract_strided_slice %109 {offsets = [0, 32], sizes = [4, 32], strides = [1, 1]} : vector<4x96xf32> to vector<4x32xf32>
    %121 = arith.addf %119, %120 : vector<4x32xf32>
    %122 = arith.negf %121 : vector<4x32xf32>
    %123 = math.exp %122 : vector<4x32xf32>
    %cst_25 = arith.constant 1.000000e+00 : f32
    %124 = vector.broadcast %cst_25 : f32 to vector<4x32xf32>
    %125 = arith.addf %124, %123 : vector<4x32xf32>
    %126 = arith.divf %124, %125 : vector<4x32xf32>
    %127 = vector.extract_strided_slice %110 {offsets = [0, 64], sizes = [4, 32], strides = [1, 1]} : vector<4x96xf32> to vector<4x32xf32>
    %128 = vector.extract_strided_slice %109 {offsets = [0, 64], sizes = [4, 32], strides = [1, 1]} : vector<4x96xf32> to vector<4x32xf32>
    %129 = arith.addf %128, %6 : vector<4x32xf32>
    %130 = arith.mulf %118, %129 : vector<4x32xf32>
    %131 = arith.addf %127, %130 : vector<4x32xf32>
    %132 = math.tanh %131 : vector<4x32xf32>
    %cst_26 = arith.constant 1.000000e+00 : f32
    %133 = vector.broadcast %cst_26 : f32 to vector<4x32xf32>
    %134 = arith.subf %133, %126 : vector<4x32xf32>
    %135 = arith.mulf %134, %132 : vector<4x32xf32>
    %136 = arith.mulf %126, %105 : vector<4x32xf32>
    %137 = arith.addf %135, %136 : vector<4x32xf32>
    %138 = arith.truncf %137 : vector<4x32xf32> to vector<4x32xbf16>
    %c12 = arith.constant 12 : index
    %c0_27 = arith.constant 0 : index
    %139 = vector.load %arg4[%c12, %c0_27] : memref<32x32xbf16, #tpu.memory_space<vmem>>, vector<4x32xbf16>
    tpu.vector_store %arg4[%c12, %c0_27], %138 {strides = array<i32>} : memref<32x32xbf16, #tpu.memory_space<vmem>>, vector<4x32xbf16>,
    %140 = arith.truncf %137 : vector<4x32xf32> to vector<4x32xbf16>
    %cst_28 = arith.constant dense<0.000000e+00> : vector<4x96xf32>
    %141 = tpu.matmul %140, %1, %cst_28 {dimension_numbers = #tpu.dot_dimension_numbers<[1], [0], [0], [1], [0, 0, 1, 1], [], []>} : vector<4x32xbf16>, vector<32x96xbf16>, vector<4x96xf32> -> vector<4x96xf32>
    %142 = vector.extract_strided_slice %10 {offsets = [16, 0], sizes = [4, 96], strides = [1, 1]} : vector<32x96xf32> to vector<4x96xf32>
    %143 = vector.extract_strided_slice %142 {offsets = [0, 0], sizes = [4, 32], strides = [1, 1]} : vector<4x96xf32> to vector<4x32xf32>
    %144 = vector.extract_strided_slice %141 {offsets = [0, 0], sizes = [4, 32], strides = [1, 1]} : vector<4x96xf32> to vector<4x32xf32>
    %145 = arith.addf %143, %144 : vector<4x32xf32>
    %146 = arith.negf %145 : vector<4x32xf32>
    %147 = math.exp %146 : vector<4x32xf32>
    %cst_29 = arith.constant 1.000000e+00 : f32
    %148 = vector.broadcast %cst_29 : f32 to vector<4x32xf32>
    %149 = arith.addf %148, %147 : vector<4x32xf32>
    %150 = arith.divf %148, %149 : vector<4x32xf32>
    %151 = vector.extract_strided_slice %142 {offsets = [0, 32], sizes = [4, 32], strides = [1, 1]} : vector<4x96xf32> to vector<4x32xf32>
    %152 = vector.extract_strided_slice %141 {offsets = [0, 32], sizes = [4, 32], strides = [1, 1]} : vector<4x96xf32> to vector<4x32xf32>
    %153 = arith.addf %151, %152 : vector<4x32xf32>
    %154 = arith.negf %153 : vector<4x32xf32>
    %155 = math.exp %154 : vector<4x32xf32>
    %cst_30 = arith.constant 1.000000e+00 : f32
    %156 = vector.broadcast %cst_30 : f32 to vector<4x32xf32>
    %157 = arith.addf %156, %155 : vector<4x32xf32>
    %158 = arith.divf %156, %157 : vector<4x32xf32>
    %159 = vector.extract_strided_slice %142 {offsets = [0, 64], sizes = [4, 32], strides = [1, 1]} : vector<4x96xf32> to vector<4x32xf32>
    %160 = vector.extract_strided_slice %141 {offsets = [0, 64], sizes = [4, 32], strides = [1, 1]} : vector<4x96xf32> to vector<4x32xf32>
    %161 = arith.addf %160, %6 : vector<4x32xf32>
    %162 = arith.mulf %150, %161 : vector<4x32xf32>
    %163 = arith.addf %159, %162 : vector<4x32xf32>
    %164 = math.tanh %163 : vector<4x32xf32>
    %cst_31 = arith.constant 1.000000e+00 : f32
    %165 = vector.broadcast %cst_31 : f32 to vector<4x32xf32>
    %166 = arith.subf %165, %158 : vector<4x32xf32>
    %167 = arith.mulf %166, %164 : vector<4x32xf32>
    %168 = arith.mulf %158, %137 : vector<4x32xf32>
    %169 = arith.addf %167, %168 : vector<4x32xf32>
    %170 = arith.truncf %169 : vector<4x32xf32> to vector<4x32xbf16>
    %c16 = arith.constant 16 : index
    %c0_32 = arith.constant 0 : index
    %171 = vector.load %arg4[%c16, %c0_32] : memref<32x32xbf16, #tpu.memory_space<vmem>>, vector<4x32xbf16>
    tpu.vector_store %arg4[%c16, %c0_32], %170 {strides = array<i32>} : memref<32x32xbf16, #tpu.memory_space<vmem>>, vector<4x32xbf16>,
    %172 = arith.truncf %169 : vector<4x32xf32> to vector<4x32xbf16>
    %cst_33 = arith.constant dense<0.000000e+00> : vector<4x96xf32>
    %173 = tpu.matmul %172, %1, %cst_33 {dimension_numbers = #tpu.dot_dimension_numbers<[1], [0], [0], [1], [0, 0, 1, 1], [], []>} : vector<4x32xbf16>, vector<32x96xbf16>, vector<4x96xf32> -> vector<4x96xf32>
    %174 = vector.extract_strided_slice %10 {offsets = [20, 0], sizes = [4, 96], strides = [1, 1]} : vector<32x96xf32> to vector<4x96xf32>
    %175 = vector.extract_strided_slice %174 {offsets = [0, 0], sizes = [4, 32], strides = [1, 1]} : vector<4x96xf32> to vector<4x32xf32>
    %176 = vector.extract_strided_slice %173 {offsets = [0, 0], sizes = [4, 32], strides = [1, 1]} : vector<4x96xf32> to vector<4x32xf32>
    %177 = arith.addf %175, %176 : vector<4x32xf32>
    %178 = arith.negf %177 : vector<4x32xf32>
    %179 = math.exp %178 : vector<4x32xf32>
    %cst_34 = arith.constant 1.000000e+00 : f32
    %180 = vector.broadcast %cst_34 : f32 to vector<4x32xf32>
    %181 = arith.addf %180, %179 : vector<4x32xf32>
    %182 = arith.divf %180, %181 : vector<4x32xf32>
    %183 = vector.extract_strided_slice %174 {offsets = [0, 32], sizes = [4, 32], strides = [1, 1]} : vector<4x96xf32> to vector<4x32xf32>
    %184 = vector.extract_strided_slice %173 {offsets = [0, 32], sizes = [4, 32], strides = [1, 1]} : vector<4x96xf32> to vector<4x32xf32>
    %185 = arith.addf %183, %184 : vector<4x32xf32>
    %186 = arith.negf %185 : vector<4x32xf32>
    %187 = math.exp %186 : vector<4x32xf32>
    %cst_35 = arith.constant 1.000000e+00 : f32
    %188 = vector.broadcast %cst_35 : f32 to vector<4x32xf32>
    %189 = arith.addf %188, %187 : vector<4x32xf32>
    %190 = arith.divf %188, %189 : vector<4x32xf32>
    %191 = vector.extract_strided_slice %174 {offsets = [0, 64], sizes = [4, 32], strides = [1, 1]} : vector<4x96xf32> to vector<4x32xf32>
    %192 = vector.extract_strided_slice %173 {offsets = [0, 64], sizes = [4, 32], strides = [1, 1]} : vector<4x96xf32> to vector<4x32xf32>
    %193 = arith.addf %192, %6 : vector<4x32xf32>
    %194 = arith.mulf %182, %193 : vector<4x32xf32>
    %195 = arith.addf %191, %194 : vector<4x32xf32>
    %196 = math.tanh %195 : vector<4x32xf32>
    %cst_36 = arith.constant 1.000000e+00 : f32
    %197 = vector.broadcast %cst_36 : f32 to vector<4x32xf32>
    %198 = arith.subf %197, %190 : vector<4x32xf32>
    %199 = arith.mulf %198, %196 : vector<4x32xf32>
    %200 = arith.mulf %190, %169 : vector<4x32xf32>
    %201 = arith.addf %199, %200 : vector<4x32xf32>
    %202 = arith.truncf %201 : vector<4x32xf32> to vector<4x32xbf16>
    %c20 = arith.constant 20 : index
    %c0_37 = arith.constant 0 : index
    %203 = vector.load %arg4[%c20, %c0_37] : memref<32x32xbf16, #tpu.memory_space<vmem>>, vector<4x32xbf16>
    tpu.vector_store %arg4[%c20, %c0_37], %202 {strides = array<i32>} : memref<32x32xbf16, #tpu.memory_space<vmem>>, vector<4x32xbf16>,
    %204 = arith.truncf %201 : vector<4x32xf32> to vector<4x32xbf16>
    %cst_38 = arith.constant dense<0.000000e+00> : vector<4x96xf32>
    %205 = tpu.matmul %204, %1, %cst_38 {dimension_numbers = #tpu.dot_dimension_numbers<[1], [0], [0], [1], [0, 0, 1, 1], [], []>} : vector<4x32xbf16>, vector<32x96xbf16>, vector<4x96xf32> -> vector<4x96xf32>
    %206 = vector.extract_strided_slice %10 {offsets = [24, 0], sizes = [4, 96], strides = [1, 1]} : vector<32x96xf32> to vector<4x96xf32>
    %207 = vector.extract_strided_slice %206 {offsets = [0, 0], sizes = [4, 32], strides = [1, 1]} : vector<4x96xf32> to vector<4x32xf32>
    %208 = vector.extract_strided_slice %205 {offsets = [0, 0], sizes = [4, 32], strides = [1, 1]} : vector<4x96xf32> to vector<4x32xf32>
    %209 = arith.addf %207, %208 : vector<4x32xf32>
    %210 = arith.negf %209 : vector<4x32xf32>
    %211 = math.exp %210 : vector<4x32xf32>
    %cst_39 = arith.constant 1.000000e+00 : f32
    %212 = vector.broadcast %cst_39 : f32 to vector<4x32xf32>
    %213 = arith.addf %212, %211 : vector<4x32xf32>
    %214 = arith.divf %212, %213 : vector<4x32xf32>
    %215 = vector.extract_strided_slice %206 {offsets = [0, 32], sizes = [4, 32], strides = [1, 1]} : vector<4x96xf32> to vector<4x32xf32>
    %216 = vector.extract_strided_slice %205 {offsets = [0, 32], sizes = [4, 32], strides = [1, 1]} : vector<4x96xf32> to vector<4x32xf32>
    %217 = arith.addf %215, %216 : vector<4x32xf32>
    %218 = arith.negf %217 : vector<4x32xf32>
    %219 = math.exp %218 : vector<4x32xf32>
    %cst_40 = arith.constant 1.000000e+00 : f32
    %220 = vector.broadcast %cst_40 : f32 to vector<4x32xf32>
    %221 = arith.addf %220, %219 : vector<4x32xf32>
    %222 = arith.divf %220, %221 : vector<4x32xf32>
    %223 = vector.extract_strided_slice %206 {offsets = [0, 64], sizes = [4, 32], strides = [1, 1]} : vector<4x96xf32> to vector<4x32xf32>
    %224 = vector.extract_strided_slice %205 {offsets = [0, 64], sizes = [4, 32], strides = [1, 1]} : vector<4x96xf32> to vector<4x32xf32>
    %225 = arith.addf %224, %6 : vector<4x32xf32>
    %226 = arith.mulf %214, %225 : vector<4x32xf32>
    %227 = arith.addf %223, %226 : vector<4x32xf32>
    %228 = math.tanh %227 : vector<4x32xf32>
    %cst_41 = arith.constant 1.000000e+00 : f32
    %229 = vector.broadcast %cst_41 : f32 to vector<4x32xf32>
    %230 = arith.subf %229, %222 : vector<4x32xf32>
    %231 = arith.mulf %230, %228 : vector<4x32xf32>
    %232 = arith.mulf %222, %201 : vector<4x32xf32>
    %233 = arith.addf %231, %232 : vector<4x32xf32>
    %234 = arith.truncf %233 : vector<4x32xf32> to vector<4x32xbf16>
    %c24 = arith.constant 24 : index
    %c0_42 = arith.constant 0 : index
    %235 = vector.load %arg4[%c24, %c0_42] : memref<32x32xbf16, #tpu.memory_space<vmem>>, vector<4x32xbf16>
    tpu.vector_store %arg4[%c24, %c0_42], %234 {strides = array<i32>} : memref<32x32xbf16, #tpu.memory_space<vmem>>, vector<4x32xbf16>,
    %236 = arith.truncf %233 : vector<4x32xf32> to vector<4x32xbf16>
    %cst_43 = arith.constant dense<0.000000e+00> : vector<4x96xf32>
    %237 = tpu.matmul %236, %1, %cst_43 {dimension_numbers = #tpu.dot_dimension_numbers<[1], [0], [0], [1], [0, 0, 1, 1], [], []>} : vector<4x32xbf16>, vector<32x96xbf16>, vector<4x96xf32> -> vector<4x96xf32>
    %238 = vector.extract_strided_slice %10 {offsets = [28, 0], sizes = [4, 96], strides = [1, 1]} : vector<32x96xf32> to vector<4x96xf32>
    %239 = vector.extract_strided_slice %238 {offsets = [0, 0], sizes = [4, 32], strides = [1, 1]} : vector<4x96xf32> to vector<4x32xf32>
    %240 = vector.extract_strided_slice %237 {offsets = [0, 0], sizes = [4, 32], strides = [1, 1]} : vector<4x96xf32> to vector<4x32xf32>
    %241 = arith.addf %239, %240 : vector<4x32xf32>
    %242 = arith.negf %241 : vector<4x32xf32>
    %243 = math.exp %242 : vector<4x32xf32>
    %cst_44 = arith.constant 1.000000e+00 : f32
    %244 = vector.broadcast %cst_44 : f32 to vector<4x32xf32>
    %245 = arith.addf %244, %243 : vector<4x32xf32>
    %246 = arith.divf %244, %245 : vector<4x32xf32>
    %247 = vector.extract_strided_slice %238 {offsets = [0, 32], sizes = [4, 32], strides = [1, 1]} : vector<4x96xf32> to vector<4x32xf32>
    %248 = vector.extract_strided_slice %237 {offsets = [0, 32], sizes = [4, 32], strides = [1, 1]} : vector<4x96xf32> to vector<4x32xf32>
    %249 = arith.addf %247, %248 : vector<4x32xf32>
    %250 = arith.negf %249 : vector<4x32xf32>
    %251 = math.exp %250 : vector<4x32xf32>
    %cst_45 = arith.constant 1.000000e+00 : f32
    %252 = vector.broadcast %cst_45 : f32 to vector<4x32xf32>
    %253 = arith.addf %252, %251 : vector<4x32xf32>
    %254 = arith.divf %252, %253 : vector<4x32xf32>
    %255 = vector.extract_strided_slice %238 {offsets = [0, 64], sizes = [4, 32], strides = [1, 1]} : vector<4x96xf32> to vector<4x32xf32>
    %256 = vector.extract_strided_slice %237 {offsets = [0, 64], sizes = [4, 32], strides = [1, 1]} : vector<4x96xf32> to vector<4x32xf32>
    %257 = arith.addf %256, %6 : vector<4x32xf32>
    %258 = arith.mulf %246, %257 : vector<4x32xf32>
    %259 = arith.addf %255, %258 : vector<4x32xf32>
    %260 = math.tanh %259 : vector<4x32xf32>
    %cst_46 = arith.constant 1.000000e+00 : f32
    %261 = vector.broadcast %cst_46 : f32 to vector<4x32xf32>
    %262 = arith.subf %261, %254 : vector<4x32xf32>
    %263 = arith.mulf %262, %260 : vector<4x32xf32>
    %264 = arith.mulf %254, %233 : vector<4x32xf32>
    %265 = arith.addf %263, %264 : vector<4x32xf32>
    %266 = arith.truncf %265 : vector<4x32xf32> to vector<4x32xbf16>
    %c28 = arith.constant 28 : index
    %c0_47 = arith.constant 0 : index
    %267 = vector.load %arg4[%c28, %c0_47] : memref<32x32xbf16, #tpu.memory_space<vmem>>, vector<4x32xbf16>
    tpu.vector_store %arg4[%c28, %c0_47], %266 {strides = array<i32>} : memref<32x32xbf16, #tpu.memory_space<vmem>>, vector<4x32xbf16>,
    %c64 = arith.constant 64 : index
    %c0_48 = arith.constant 0 : index
    %268 = vector.load %arg1[%c64, %c0_48] : memref<192x96xbf16, #tpu.memory_space<vmem>>, vector<32x96xbf16>
    %c96 = arith.constant 96 : index
    %c0_49 = arith.constant 0 : index
    %269 = vector.load %arg1[%c96, %c0_49] : memref<192x96xbf16, #tpu.memory_space<vmem>>, vector<32x96xbf16>
    %c1 = arith.constant 1 : index
    %c0_50 = arith.constant 0 : index
    %270 = vector.load %arg2[%c1, %c0_50] : memref<3x128xf32, #tpu.memory_space<vmem>>, vector<1x128xf32>
    %271 = vector.extract_strided_slice %270 {offsets = [0, 0], sizes = [1, 96], strides = [1, 1]} : vector<1x128xf32> to vector<1x96xf32>
    %272 = vector.extract_strided_slice %270 {offsets = [0, 96], sizes = [1, 32], strides = [1, 1]} : vector<1x128xf32> to vector<1x32xf32>
    %273 = vector.shape_cast %272 : vector<1x32xf32> to vector<1x32xf32>
    %274 = vector.broadcast %273 : vector<1x32xf32> to vector<4x32xf32>
    %c0_51 = arith.constant 0 : index
    %c0_52 = arith.constant 0 : index
    %275 = vector.load %arg4[%c0_51, %c0_52] : memref<32x32xbf16, #tpu.memory_space<vmem>>, vector<32x32xbf16>
    %cst_53 = arith.constant dense<0.000000e+00> : vector<32x96xf32>
    %276 = tpu.matmul %275, %268, %cst_53 {dimension_numbers = #tpu.dot_dimension_numbers<[1], [0], [0], [1], [0, 0, 1, 1], [], []>} : vector<32x32xbf16>, vector<32x96xbf16>, vector<32x96xf32> -> vector<32x96xf32>
    %277 = vector.broadcast %271 : vector<1x96xf32> to vector<32x96xf32>
    %278 = arith.addf %276, %277 : vector<32x96xf32>
    %cst_54 = arith.constant 0.000000e+00 : f32
    %279 = vector.broadcast %cst_54 : f32 to vector<4x32xf32>
    %280 = arith.truncf %279 : vector<4x32xf32> to vector<4x32xbf16>
    %cst_55 = arith.constant dense<0.000000e+00> : vector<4x96xf32>
    %281 = tpu.matmul %280, %269, %cst_55 {dimension_numbers = #tpu.dot_dimension_numbers<[1], [0], [0], [1], [0, 0, 1, 1], [], []>} : vector<4x32xbf16>, vector<32x96xbf16>, vector<4x96xf32> -> vector<4x96xf32>
    %282 = vector.extract_strided_slice %278 {offsets = [0, 0], sizes = [4, 96], strides = [1, 1]} : vector<32x96xf32> to vector<4x96xf32>
    %283 = vector.extract_strided_slice %282 {offsets = [0, 0], sizes = [4, 32], strides = [1, 1]} : vector<4x96xf32> to vector<4x32xf32>
    %284 = vector.extract_strided_slice %281 {offsets = [0, 0], sizes = [4, 32], strides = [1, 1]} : vector<4x96xf32> to vector<4x32xf32>
    %285 = arith.addf %283, %284 : vector<4x32xf32>
    %286 = arith.negf %285 : vector<4x32xf32>
    %287 = math.exp %286 : vector<4x32xf32>
    %cst_56 = arith.constant 1.000000e+00 : f32
    %288 = vector.broadcast %cst_56 : f32 to vector<4x32xf32>
    %289 = arith.addf %288, %287 : vector<4x32xf32>
    %290 = arith.divf %288, %289 : vector<4x32xf32>
    %291 = vector.extract_strided_slice %282 {offsets = [0, 32], sizes = [4, 32], strides = [1, 1]} : vector<4x96xf32> to vector<4x32xf32>
    %292 = vector.extract_strided_slice %281 {offsets = [0, 32], sizes = [4, 32], strides = [1, 1]} : vector<4x96xf32> to vector<4x32xf32>
    %293 = arith.addf %291, %292 : vector<4x32xf32>
    %294 = arith.negf %293 : vector<4x32xf32>
    %295 = math.exp %294 : vector<4x32xf32>
    %cst_57 = arith.constant 1.000000e+00 : f32
    %296 = vector.broadcast %cst_57 : f32 to vector<4x32xf32>
    %297 = arith.addf %296, %295 : vector<4x32xf32>
    %298 = arith.divf %296, %297 : vector<4x32xf32>
    %299 = vector.extract_strided_slice %282 {offsets = [0, 64], sizes = [4, 32], strides = [1, 1]} : vector<4x96xf32> to vector<4x32xf32>
    %300 = vector.extract_strided_slice %281 {offsets = [0, 64], sizes = [4, 32], strides = [1, 1]} : vector<4x96xf32> to vector<4x32xf32>
    %301 = arith.addf %300, %274 : vector<4x32xf32>
    %302 = arith.mulf %290, %301 : vector<4x32xf32>
    %303 = arith.addf %299, %302 : vector<4x32xf32>
    %304 = math.tanh %303 : vector<4x32xf32>
    %cst_58 = arith.constant 1.000000e+00 : f32
    %305 = vector.broadcast %cst_58 : f32 to vector<4x32xf32>
    %306 = arith.subf %305, %298 : vector<4x32xf32>
    %307 = arith.mulf %306, %304 : vector<4x32xf32>
    %308 = arith.mulf %298, %279 : vector<4x32xf32>
    %309 = arith.addf %307, %308 : vector<4x32xf32>
    %310 = arith.truncf %309 : vector<4x32xf32> to vector<4x32xbf16>
    %c0_59 = arith.constant 0 : index
    %c0_60 = arith.constant 0 : index
    %311 = vector.load %arg4[%c0_59, %c0_60] : memref<32x32xbf16, #tpu.memory_space<vmem>>, vector<4x32xbf16>
    tpu.vector_store %arg4[%c0_59, %c0_60], %310 {strides = array<i32>} : memref<32x32xbf16, #tpu.memory_space<vmem>>, vector<4x32xbf16>,
    %312 = arith.truncf %309 : vector<4x32xf32> to vector<4x32xbf16>
    %cst_61 = arith.constant dense<0.000000e+00> : vector<4x96xf32>
    %313 = tpu.matmul %312, %269, %cst_61 {dimension_numbers = #tpu.dot_dimension_numbers<[1], [0], [0], [1], [0, 0, 1, 1], [], []>} : vector<4x32xbf16>, vector<32x96xbf16>, vector<4x96xf32> -> vector<4x96xf32>
    %314 = vector.extract_strided_slice %278 {offsets = [4, 0], sizes = [4, 96], strides = [1, 1]} : vector<32x96xf32> to vector<4x96xf32>
    %315 = vector.extract_strided_slice %314 {offsets = [0, 0], sizes = [4, 32], strides = [1, 1]} : vector<4x96xf32> to vector<4x32xf32>
    %316 = vector.extract_strided_slice %313 {offsets = [0, 0], sizes = [4, 32], strides = [1, 1]} : vector<4x96xf32> to vector<4x32xf32>
    %317 = arith.addf %315, %316 : vector<4x32xf32>
    %318 = arith.negf %317 : vector<4x32xf32>
    %319 = math.exp %318 : vector<4x32xf32>
    %cst_62 = arith.constant 1.000000e+00 : f32
    %320 = vector.broadcast %cst_62 : f32 to vector<4x32xf32>
    %321 = arith.addf %320, %319 : vector<4x32xf32>
    %322 = arith.divf %320, %321 : vector<4x32xf32>
    %323 = vector.extract_strided_slice %314 {offsets = [0, 32], sizes = [4, 32], strides = [1, 1]} : vector<4x96xf32> to vector<4x32xf32>
    %324 = vector.extract_strided_slice %313 {offsets = [0, 32], sizes = [4, 32], strides = [1, 1]} : vector<4x96xf32> to vector<4x32xf32>
    %325 = arith.addf %323, %324 : vector<4x32xf32>
    %326 = arith.negf %325 : vector<4x32xf32>
    %327 = math.exp %326 : vector<4x32xf32>
    %cst_63 = arith.constant 1.000000e+00 : f32
    %328 = vector.broadcast %cst_63 : f32 to vector<4x32xf32>
    %329 = arith.addf %328, %327 : vector<4x32xf32>
    %330 = arith.divf %328, %329 : vector<4x32xf32>
    %331 = vector.extract_strided_slice %314 {offsets = [0, 64], sizes = [4, 32], strides = [1, 1]} : vector<4x96xf32> to vector<4x32xf32>
    %332 = vector.extract_strided_slice %313 {offsets = [0, 64], sizes = [4, 32], strides = [1, 1]} : vector<4x96xf32> to vector<4x32xf32>
    %333 = arith.addf %332, %274 : vector<4x32xf32>
    %334 = arith.mulf %322, %333 : vector<4x32xf32>
    %335 = arith.addf %331, %334 : vector<4x32xf32>
    %336 = math.tanh %335 : vector<4x32xf32>
    %cst_64 = arith.constant 1.000000e+00 : f32
    %337 = vector.broadcast %cst_64 : f32 to vector<4x32xf32>
    %338 = arith.subf %337, %330 : vector<4x32xf32>
    %339 = arith.mulf %338, %336 : vector<4x32xf32>
    %340 = arith.mulf %330, %309 : vector<4x32xf32>
    %341 = arith.addf %339, %340 : vector<4x32xf32>
    %342 = arith.truncf %341 : vector<4x32xf32> to vector<4x32xbf16>
    %c4_65 = arith.constant 4 : index
    %c0_66 = arith.constant 0 : index
    %343 = vector.load %arg4[%c4_65, %c0_66] : memref<32x32xbf16, #tpu.memory_space<vmem>>, vector<4x32xbf16>
    tpu.vector_store %arg4[%c4_65, %c0_66], %342 {strides = array<i32>} : memref<32x32xbf16, #tpu.memory_space<vmem>>, vector<4x32xbf16>,
    %344 = arith.truncf %341 : vector<4x32xf32> to vector<4x32xbf16>
    %cst_67 = arith.constant dense<0.000000e+00> : vector<4x96xf32>
    %345 = tpu.matmul %344, %269, %cst_67 {dimension_numbers = #tpu.dot_dimension_numbers<[1], [0], [0], [1], [0, 0, 1, 1], [], []>} : vector<4x32xbf16>, vector<32x96xbf16>, vector<4x96xf32> -> vector<4x96xf32>
    %346 = vector.extract_strided_slice %278 {offsets = [8, 0], sizes = [4, 96], strides = [1, 1]} : vector<32x96xf32> to vector<4x96xf32>
    %347 = vector.extract_strided_slice %346 {offsets = [0, 0], sizes = [4, 32], strides = [1, 1]} : vector<4x96xf32> to vector<4x32xf32>
    %348 = vector.extract_strided_slice %345 {offsets = [0, 0], sizes = [4, 32], strides = [1, 1]} : vector<4x96xf32> to vector<4x32xf32>
    %349 = arith.addf %347, %348 : vector<4x32xf32>
    %350 = arith.negf %349 : vector<4x32xf32>
    %351 = math.exp %350 : vector<4x32xf32>
    %cst_68 = arith.constant 1.000000e+00 : f32
    %352 = vector.broadcast %cst_68 : f32 to vector<4x32xf32>
    %353 = arith.addf %352, %351 : vector<4x32xf32>
    %354 = arith.divf %352, %353 : vector<4x32xf32>
    %355 = vector.extract_strided_slice %346 {offsets = [0, 32], sizes = [4, 32], strides = [1, 1]} : vector<4x96xf32> to vector<4x32xf32>
    %356 = vector.extract_strided_slice %345 {offsets = [0, 32], sizes = [4, 32], strides = [1, 1]} : vector<4x96xf32> to vector<4x32xf32>
    %357 = arith.addf %355, %356 : vector<4x32xf32>
    %358 = arith.negf %357 : vector<4x32xf32>
    %359 = math.exp %358 : vector<4x32xf32>
    %cst_69 = arith.constant 1.000000e+00 : f32
    %360 = vector.broadcast %cst_69 : f32 to vector<4x32xf32>
    %361 = arith.addf %360, %359 : vector<4x32xf32>
    %362 = arith.divf %360, %361 : vector<4x32xf32>
    %363 = vector.extract_strided_slice %346 {offsets = [0, 64], sizes = [4, 32], strides = [1, 1]} : vector<4x96xf32> to vector<4x32xf32>
    %364 = vector.extract_strided_slice %345 {offsets = [0, 64], sizes = [4, 32], strides = [1, 1]} : vector<4x96xf32> to vector<4x32xf32>
    %365 = arith.addf %364, %274 : vector<4x32xf32>
    %366 = arith.mulf %354, %365 : vector<4x32xf32>
    %367 = arith.addf %363, %366 : vector<4x32xf32>
    %368 = math.tanh %367 : vector<4x32xf32>
    %cst_70 = arith.constant 1.000000e+00 : f32
    %369 = vector.broadcast %cst_70 : f32 to vector<4x32xf32>
    %370 = arith.subf %369, %362 : vector<4x32xf32>
    %371 = arith.mulf %370, %368 : vector<4x32xf32>
    %372 = arith.mulf %362, %341 : vector<4x32xf32>
    %373 = arith.addf %371, %372 : vector<4x32xf32>
    %374 = arith.truncf %373 : vector<4x32xf32> to vector<4x32xbf16>
    %c8_71 = arith.constant 8 : index
    %c0_72 = arith.constant 0 : index
    %375 = vector.load %arg4[%c8_71, %c0_72] : memref<32x32xbf16, #tpu.memory_space<vmem>>, vector<4x32xbf16>
    tpu.vector_store %arg4[%c8_71, %c0_72], %374 {strides = array<i32>} : memref<32x32xbf16, #tpu.memory_space<vmem>>, vector<4x32xbf16>,
    %376 = arith.truncf %373 : vector<4x32xf32> to vector<4x32xbf16>
    %cst_73 = arith.constant dense<0.000000e+00> : vector<4x96xf32>
    %377 = tpu.matmul %376, %269, %cst_73 {dimension_numbers = #tpu.dot_dimension_numbers<[1], [0], [0], [1], [0, 0, 1, 1], [], []>} : vector<4x32xbf16>, vector<32x96xbf16>, vector<4x96xf32> -> vector<4x96xf32>
    %378 = vector.extract_strided_slice %278 {offsets = [12, 0], sizes = [4, 96], strides = [1, 1]} : vector<32x96xf32> to vector<4x96xf32>
    %379 = vector.extract_strided_slice %378 {offsets = [0, 0], sizes = [4, 32], strides = [1, 1]} : vector<4x96xf32> to vector<4x32xf32>
    %380 = vector.extract_strided_slice %377 {offsets = [0, 0], sizes = [4, 32], strides = [1, 1]} : vector<4x96xf32> to vector<4x32xf32>
    %381 = arith.addf %379, %380 : vector<4x32xf32>
    %382 = arith.negf %381 : vector<4x32xf32>
    %383 = math.exp %382 : vector<4x32xf32>
    %cst_74 = arith.constant 1.000000e+00 : f32
    %384 = vector.broadcast %cst_74 : f32 to vector<4x32xf32>
    %385 = arith.addf %384, %383 : vector<4x32xf32>
    %386 = arith.divf %384, %385 : vector<4x32xf32>
    %387 = vector.extract_strided_slice %378 {offsets = [0, 32], sizes = [4, 32], strides = [1, 1]} : vector<4x96xf32> to vector<4x32xf32>
    %388 = vector.extract_strided_slice %377 {offsets = [0, 32], sizes = [4, 32], strides = [1, 1]} : vector<4x96xf32> to vector<4x32xf32>
    %389 = arith.addf %387, %388 : vector<4x32xf32>
    %390 = arith.negf %389 : vector<4x32xf32>
    %391 = math.exp %390 : vector<4x32xf32>
    %cst_75 = arith.constant 1.000000e+00 : f32
    %392 = vector.broadcast %cst_75 : f32 to vector<4x32xf32>
    %393 = arith.addf %392, %391 : vector<4x32xf32>
    %394 = arith.divf %392, %393 : vector<4x32xf32>
    %395 = vector.extract_strided_slice %378 {offsets = [0, 64], sizes = [4, 32], strides = [1, 1]} : vector<4x96xf32> to vector<4x32xf32>
    %396 = vector.extract_strided_slice %377 {offsets = [0, 64], sizes = [4, 32], strides = [1, 1]} : vector<4x96xf32> to vector<4x32xf32>
    %397 = arith.addf %396, %274 : vector<4x32xf32>
    %398 = arith.mulf %386, %397 : vector<4x32xf32>
    %399 = arith.addf %395, %398 : vector<4x32xf32>
    %400 = math.tanh %399 : vector<4x32xf32>
    %cst_76 = arith.constant 1.000000e+00 : f32
    %401 = vector.broadcast %cst_76 : f32 to vector<4x32xf32>
    %402 = arith.subf %401, %394 : vector<4x32xf32>
    %403 = arith.mulf %402, %400 : vector<4x32xf32>
    %404 = arith.mulf %394, %373 : vector<4x32xf32>
    %405 = arith.addf %403, %404 : vector<4x32xf32>
    %406 = arith.truncf %405 : vector<4x32xf32> to vector<4x32xbf16>
    %c12_77 = arith.constant 12 : index
    %c0_78 = arith.constant 0 : index
    %407 = vector.load %arg4[%c12_77, %c0_78] : memref<32x32xbf16, #tpu.memory_space<vmem>>, vector<4x32xbf16>
    tpu.vector_store %arg4[%c12_77, %c0_78], %406 {strides = array<i32>} : memref<32x32xbf16, #tpu.memory_space<vmem>>, vector<4x32xbf16>,
    %408 = arith.truncf %405 : vector<4x32xf32> to vector<4x32xbf16>
    %cst_79 = arith.constant dense<0.000000e+00> : vector<4x96xf32>
    %409 = tpu.matmul %408, %269, %cst_79 {dimension_numbers = #tpu.dot_dimension_numbers<[1], [0], [0], [1], [0, 0, 1, 1], [], []>} : vector<4x32xbf16>, vector<32x96xbf16>, vector<4x96xf32> -> vector<4x96xf32>
    %410 = vector.extract_strided_slice %278 {offsets = [16, 0], sizes = [4, 96], strides = [1, 1]} : vector<32x96xf32> to vector<4x96xf32>
    %411 = vector.extract_strided_slice %410 {offsets = [0, 0], sizes = [4, 32], strides = [1, 1]} : vector<4x96xf32> to vector<4x32xf32>
    %412 = vector.extract_strided_slice %409 {offsets = [0, 0], sizes = [4, 32], strides = [1, 1]} : vector<4x96xf32> to vector<4x32xf32>
    %413 = arith.addf %411, %412 : vector<4x32xf32>
    %414 = arith.negf %413 : vector<4x32xf32>
    %415 = math.exp %414 : vector<4x32xf32>
    %cst_80 = arith.constant 1.000000e+00 : f32
    %416 = vector.broadcast %cst_80 : f32 to vector<4x32xf32>
    %417 = arith.addf %416, %415 : vector<4x32xf32>
    %418 = arith.divf %416, %417 : vector<4x32xf32>
    %419 = vector.extract_strided_slice %410 {offsets = [0, 32], sizes = [4, 32], strides = [1, 1]} : vector<4x96xf32> to vector<4x32xf32>
    %420 = vector.extract_strided_slice %409 {offsets = [0, 32], sizes = [4, 32], strides = [1, 1]} : vector<4x96xf32> to vector<4x32xf32>
    %421 = arith.addf %419, %420 : vector<4x32xf32>
    %422 = arith.negf %421 : vector<4x32xf32>
    %423 = math.exp %422 : vector<4x32xf32>
    %cst_81 = arith.constant 1.000000e+00 : f32
    %424 = vector.broadcast %cst_81 : f32 to vector<4x32xf32>
    %425 = arith.addf %424, %423 : vector<4x32xf32>
    %426 = arith.divf %424, %425 : vector<4x32xf32>
    %427 = vector.extract_strided_slice %410 {offsets = [0, 64], sizes = [4, 32], strides = [1, 1]} : vector<4x96xf32> to vector<4x32xf32>
    %428 = vector.extract_strided_slice %409 {offsets = [0, 64], sizes = [4, 32], strides = [1, 1]} : vector<4x96xf32> to vector<4x32xf32>
    %429 = arith.addf %428, %274 : vector<4x32xf32>
    %430 = arith.mulf %418, %429 : vector<4x32xf32>
    %431 = arith.addf %427, %430 : vector<4x32xf32>
    %432 = math.tanh %431 : vector<4x32xf32>
    %cst_82 = arith.constant 1.000000e+00 : f32
    %433 = vector.broadcast %cst_82 : f32 to vector<4x32xf32>
    %434 = arith.subf %433, %426 : vector<4x32xf32>
    %435 = arith.mulf %434, %432 : vector<4x32xf32>
    %436 = arith.mulf %426, %405 : vector<4x32xf32>
    %437 = arith.addf %435, %436 : vector<4x32xf32>
    %438 = arith.truncf %437 : vector<4x32xf32> to vector<4x32xbf16>
    %c16_83 = arith.constant 16 : index
    %c0_84 = arith.constant 0 : index
    %439 = vector.load %arg4[%c16_83, %c0_84] : memref<32x32xbf16, #tpu.memory_space<vmem>>, vector<4x32xbf16>
    tpu.vector_store %arg4[%c16_83, %c0_84], %438 {strides = array<i32>} : memref<32x32xbf16, #tpu.memory_space<vmem>>, vector<4x32xbf16>,
    %440 = arith.truncf %437 : vector<4x32xf32> to vector<4x32xbf16>
    %cst_85 = arith.constant dense<0.000000e+00> : vector<4x96xf32>
    %441 = tpu.matmul %440, %269, %cst_85 {dimension_numbers = #tpu.dot_dimension_numbers<[1], [0], [0], [1], [0, 0, 1, 1], [], []>} : vector<4x32xbf16>, vector<32x96xbf16>, vector<4x96xf32> -> vector<4x96xf32>
    %442 = vector.extract_strided_slice %278 {offsets = [20, 0], sizes = [4, 96], strides = [1, 1]} : vector<32x96xf32> to vector<4x96xf32>
    %443 = vector.extract_strided_slice %442 {offsets = [0, 0], sizes = [4, 32], strides = [1, 1]} : vector<4x96xf32> to vector<4x32xf32>
    %444 = vector.extract_strided_slice %441 {offsets = [0, 0], sizes = [4, 32], strides = [1, 1]} : vector<4x96xf32> to vector<4x32xf32>
    %445 = arith.addf %443, %444 : vector<4x32xf32>
    %446 = arith.negf %445 : vector<4x32xf32>
    %447 = math.exp %446 : vector<4x32xf32>
    %cst_86 = arith.constant 1.000000e+00 : f32
    %448 = vector.broadcast %cst_86 : f32 to vector<4x32xf32>
    %449 = arith.addf %448, %447 : vector<4x32xf32>
    %450 = arith.divf %448, %449 : vector<4x32xf32>
    %451 = vector.extract_strided_slice %442 {offsets = [0, 32], sizes = [4, 32], strides = [1, 1]} : vector<4x96xf32> to vector<4x32xf32>
    %452 = vector.extract_strided_slice %441 {offsets = [0, 32], sizes = [4, 32], strides = [1, 1]} : vector<4x96xf32> to vector<4x32xf32>
    %453 = arith.addf %451, %452 : vector<4x32xf32>
    %454 = arith.negf %453 : vector<4x32xf32>
    %455 = math.exp %454 : vector<4x32xf32>
    %cst_87 = arith.constant 1.000000e+00 : f32
    %456 = vector.broadcast %cst_87 : f32 to vector<4x32xf32>
    %457 = arith.addf %456, %455 : vector<4x32xf32>
    %458 = arith.divf %456, %457 : vector<4x32xf32>
    %459 = vector.extract_strided_slice %442 {offsets = [0, 64], sizes = [4, 32], strides = [1, 1]} : vector<4x96xf32> to vector<4x32xf32>
    %460 = vector.extract_strided_slice %441 {offsets = [0, 64], sizes = [4, 32], strides = [1, 1]} : vector<4x96xf32> to vector<4x32xf32>
    %461 = arith.addf %460, %274 : vector<4x32xf32>
    %462 = arith.mulf %450, %461 : vector<4x32xf32>
    %463 = arith.addf %459, %462 : vector<4x32xf32>
    %464 = math.tanh %463 : vector<4x32xf32>
    %cst_88 = arith.constant 1.000000e+00 : f32
    %465 = vector.broadcast %cst_88 : f32 to vector<4x32xf32>
    %466 = arith.subf %465, %458 : vector<4x32xf32>
    %467 = arith.mulf %466, %464 : vector<4x32xf32>
    %468 = arith.mulf %458, %437 : vector<4x32xf32>
    %469 = arith.addf %467, %468 : vector<4x32xf32>
    %470 = arith.truncf %469 : vector<4x32xf32> to vector<4x32xbf16>
    %c20_89 = arith.constant 20 : index
    %c0_90 = arith.constant 0 : index
    %471 = vector.load %arg4[%c20_89, %c0_90] : memref<32x32xbf16, #tpu.memory_space<vmem>>, vector<4x32xbf16>
    tpu.vector_store %arg4[%c20_89, %c0_90], %470 {strides = array<i32>} : memref<32x32xbf16, #tpu.memory_space<vmem>>, vector<4x32xbf16>,
    %472 = arith.truncf %469 : vector<4x32xf32> to vector<4x32xbf16>
    %cst_91 = arith.constant dense<0.000000e+00> : vector<4x96xf32>
    %473 = tpu.matmul %472, %269, %cst_91 {dimension_numbers = #tpu.dot_dimension_numbers<[1], [0], [0], [1], [0, 0, 1, 1], [], []>} : vector<4x32xbf16>, vector<32x96xbf16>, vector<4x96xf32> -> vector<4x96xf32>
    %474 = vector.extract_strided_slice %278 {offsets = [24, 0], sizes = [4, 96], strides = [1, 1]} : vector<32x96xf32> to vector<4x96xf32>
    %475 = vector.extract_strided_slice %474 {offsets = [0, 0], sizes = [4, 32], strides = [1, 1]} : vector<4x96xf32> to vector<4x32xf32>
    %476 = vector.extract_strided_slice %473 {offsets = [0, 0], sizes = [4, 32], strides = [1, 1]} : vector<4x96xf32> to vector<4x32xf32>
    %477 = arith.addf %475, %476 : vector<4x32xf32>
    %478 = arith.negf %477 : vector<4x32xf32>
    %479 = math.exp %478 : vector<4x32xf32>
    %cst_92 = arith.constant 1.000000e+00 : f32
    %480 = vector.broadcast %cst_92 : f32 to vector<4x32xf32>
    %481 = arith.addf %480, %479 : vector<4x32xf32>
    %482 = arith.divf %480, %481 : vector<4x32xf32>
    %483 = vector.extract_strided_slice %474 {offsets = [0, 32], sizes = [4, 32], strides = [1, 1]} : vector<4x96xf32> to vector<4x32xf32>
    %484 = vector.extract_strided_slice %473 {offsets = [0, 32], sizes = [4, 32], strides = [1, 1]} : vector<4x96xf32> to vector<4x32xf32>
    %485 = arith.addf %483, %484 : vector<4x32xf32>
    %486 = arith.negf %485 : vector<4x32xf32>
    %487 = math.exp %486 : vector<4x32xf32>
    %cst_93 = arith.constant 1.000000e+00 : f32
    %488 = vector.broadcast %cst_93 : f32 to vector<4x32xf32>
    %489 = arith.addf %488, %487 : vector<4x32xf32>
    %490 = arith.divf %488, %489 : vector<4x32xf32>
    %491 = vector.extract_strided_slice %474 {offsets = [0, 64], sizes = [4, 32], strides = [1, 1]} : vector<4x96xf32> to vector<4x32xf32>
    %492 = vector.extract_strided_slice %473 {offsets = [0, 64], sizes = [4, 32], strides = [1, 1]} : vector<4x96xf32> to vector<4x32xf32>
    %493 = arith.addf %492, %274 : vector<4x32xf32>
    %494 = arith.mulf %482, %493 : vector<4x32xf32>
    %495 = arith.addf %491, %494 : vector<4x32xf32>
    %496 = math.tanh %495 : vector<4x32xf32>
    %cst_94 = arith.constant 1.000000e+00 : f32
    %497 = vector.broadcast %cst_94 : f32 to vector<4x32xf32>
    %498 = arith.subf %497, %490 : vector<4x32xf32>
    %499 = arith.mulf %498, %496 : vector<4x32xf32>
    %500 = arith.mulf %490, %469 : vector<4x32xf32>
    %501 = arith.addf %499, %500 : vector<4x32xf32>
    %502 = arith.truncf %501 : vector<4x32xf32> to vector<4x32xbf16>
    %c24_95 = arith.constant 24 : index
    %c0_96 = arith.constant 0 : index
    %503 = vector.load %arg4[%c24_95, %c0_96] : memref<32x32xbf16, #tpu.memory_space<vmem>>, vector<4x32xbf16>
    tpu.vector_store %arg4[%c24_95, %c0_96], %502 {strides = array<i32>} : memref<32x32xbf16, #tpu.memory_space<vmem>>, vector<4x32xbf16>,
    %504 = arith.truncf %501 : vector<4x32xf32> to vector<4x32xbf16>
    %cst_97 = arith.constant dense<0.000000e+00> : vector<4x96xf32>
    %505 = tpu.matmul %504, %269, %cst_97 {dimension_numbers = #tpu.dot_dimension_numbers<[1], [0], [0], [1], [0, 0, 1, 1], [], []>} : vector<4x32xbf16>, vector<32x96xbf16>, vector<4x96xf32> -> vector<4x96xf32>
    %506 = vector.extract_strided_slice %278 {offsets = [28, 0], sizes = [4, 96], strides = [1, 1]} : vector<32x96xf32> to vector<4x96xf32>
    %507 = vector.extract_strided_slice %506 {offsets = [0, 0], sizes = [4, 32], strides = [1, 1]} : vector<4x96xf32> to vector<4x32xf32>
    %508 = vector.extract_strided_slice %505 {offsets = [0, 0], sizes = [4, 32], strides = [1, 1]} : vector<4x96xf32> to vector<4x32xf32>
    %509 = arith.addf %507, %508 : vector<4x32xf32>
    %510 = arith.negf %509 : vector<4x32xf32>
    %511 = math.exp %510 : vector<4x32xf32>
    %cst_98 = arith.constant 1.000000e+00 : f32
    %512 = vector.broadcast %cst_98 : f32 to vector<4x32xf32>
    %513 = arith.addf %512, %511 : vector<4x32xf32>
    %514 = arith.divf %512, %513 : vector<4x32xf32>
    %515 = vector.extract_strided_slice %506 {offsets = [0, 32], sizes = [4, 32], strides = [1, 1]} : vector<4x96xf32> to vector<4x32xf32>
    %516 = vector.extract_strided_slice %505 {offsets = [0, 32], sizes = [4, 32], strides = [1, 1]} : vector<4x96xf32> to vector<4x32xf32>
    %517 = arith.addf %515, %516 : vector<4x32xf32>
    %518 = arith.negf %517 : vector<4x32xf32>
    %519 = math.exp %518 : vector<4x32xf32>
    %cst_99 = arith.constant 1.000000e+00 : f32
    %520 = vector.broadcast %cst_99 : f32 to vector<4x32xf32>
    %521 = arith.addf %520, %519 : vector<4x32xf32>
    %522 = arith.divf %520, %521 : vector<4x32xf32>
    %523 = vector.extract_strided_slice %506 {offsets = [0, 64], sizes = [4, 32], strides = [1, 1]} : vector<4x96xf32> to vector<4x32xf32>
    %524 = vector.extract_strided_slice %505 {offsets = [0, 64], sizes = [4, 32], strides = [1, 1]} : vector<4x96xf32> to vector<4x32xf32>
    %525 = arith.addf %524, %274 : vector<4x32xf32>
    %526 = arith.mulf %514, %525 : vector<4x32xf32>
    %527 = arith.addf %523, %526 : vector<4x32xf32>
    %528 = math.tanh %527 : vector<4x32xf32>
    %cst_100 = arith.constant 1.000000e+00 : f32
    %529 = vector.broadcast %cst_100 : f32 to vector<4x32xf32>
    %530 = arith.subf %529, %522 : vector<4x32xf32>
    %531 = arith.mulf %530, %528 : vector<4x32xf32>
    %532 = arith.mulf %522, %501 : vector<4x32xf32>
    %533 = arith.addf %531, %532 : vector<4x32xf32>
    %534 = arith.truncf %533 : vector<4x32xf32> to vector<4x32xbf16>
    %c28_101 = arith.constant 28 : index
    %c0_102 = arith.constant 0 : index
    %535 = vector.load %arg4[%c28_101, %c0_102] : memref<32x32xbf16, #tpu.memory_space<vmem>>, vector<4x32xbf16>
    tpu.vector_store %arg4[%c28_101, %c0_102], %534 {strides = array<i32>} : memref<32x32xbf16, #tpu.memory_space<vmem>>, vector<4x32xbf16>,
    %c128 = arith.constant 128 : index
    %c0_103 = arith.constant 0 : index
    %536 = vector.load %arg1[%c128, %c0_103] : memref<192x96xbf16, #tpu.memory_space<vmem>>, vector<32x32xbf16>
    %c2 = arith.constant 2 : index
    %c0_104 = arith.constant 0 : index
    %537 = vector.load %arg2[%c2, %c0_104] : memref<3x128xf32, #tpu.memory_space<vmem>>, vector<1x32xf32>
    %c0_105 = arith.constant 0 : index
    %c0_106 = arith.constant 0 : index
    %538 = vector.load %arg4[%c0_105, %c0_106] : memref<32x32xbf16, #tpu.memory_space<vmem>>, vector<32x32xbf16>
    %cst_107 = arith.constant dense<0.000000e+00> : vector<32x32xf32>
    %539 = tpu.matmul %538, %536, %cst_107 {dimension_numbers = #tpu.dot_dimension_numbers<[1], [0], [0], [1], [0, 0, 1, 1], [], []>} : vector<32x32xbf16>, vector<32x32xbf16>, vector<32x32xf32> -> vector<32x32xf32>
    %540 = vector.broadcast %537 : vector<1x32xf32> to vector<32x32xf32>
    %541 = arith.addf %539, %540 : vector<32x32xf32>
    %542 = arith.negf %541 : vector<32x32xf32>
    %543 = math.exp %542 : vector<32x32xf32>
    %cst_108 = arith.constant 1.000000e+00 : f32
    %544 = vector.broadcast %cst_108 : f32 to vector<32x32xf32>
    %545 = arith.addf %544, %543 : vector<32x32xf32>
    %546 = arith.divf %544, %545 : vector<32x32xf32>
    %547 = vector.extract_strided_slice %546 {offsets = [0, 0], sizes = [4, 32], strides = [1, 1]} : vector<32x32xf32> to vector<4x32xf32>
    %c0_109 = arith.constant 0 : index
    %c0_110 = arith.constant 0 : index
    %548 = vector.load %arg3[%c0_109, %c0_110] : memref<4x256xf32, #tpu.memory_space<vmem>>, vector<4x32xf32>
    tpu.vector_store %arg3[%c0_109, %c0_110], %547 {strides = array<i32>} : memref<4x256xf32, #tpu.memory_space<vmem>>, vector<4x32xf32>,
    %549 = vector.extract_strided_slice %546 {offsets = [4, 0], sizes = [4, 32], strides = [1, 1]} : vector<32x32xf32> to vector<4x32xf32>
    %c0_111 = arith.constant 0 : index
    %c32_112 = arith.constant 32 : index
    %550 = vector.load %arg3[%c0_111, %c32_112] : memref<4x256xf32, #tpu.memory_space<vmem>>, vector<4x32xf32>
    tpu.vector_store %arg3[%c0_111, %c32_112], %549 {strides = array<i32>} : memref<4x256xf32, #tpu.memory_space<vmem>>, vector<4x32xf32>,
    %551 = vector.extract_strided_slice %546 {offsets = [8, 0], sizes = [4, 32], strides = [1, 1]} : vector<32x32xf32> to vector<4x32xf32>
    %c0_113 = arith.constant 0 : index
    %c64_114 = arith.constant 64 : index
    %552 = vector.load %arg3[%c0_113, %c64_114] : memref<4x256xf32, #tpu.memory_space<vmem>>, vector<4x32xf32>
    tpu.vector_store %arg3[%c0_113, %c64_114], %551 {strides = array<i32>} : memref<4x256xf32, #tpu.memory_space<vmem>>, vector<4x32xf32>,
    %553 = vector.extract_strided_slice %546 {offsets = [12, 0], sizes = [4, 32], strides = [1, 1]} : vector<32x32xf32> to vector<4x32xf32>
    %c0_115 = arith.constant 0 : index
    %c96_116 = arith.constant 96 : index
    %554 = vector.load %arg3[%c0_115, %c96_116] : memref<4x256xf32, #tpu.memory_space<vmem>>, vector<4x32xf32>
    tpu.vector_store %arg3[%c0_115, %c96_116], %553 {strides = array<i32>} : memref<4x256xf32, #tpu.memory_space<vmem>>, vector<4x32xf32>,
    %555 = vector.extract_strided_slice %546 {offsets = [16, 0], sizes = [4, 32], strides = [1, 1]} : vector<32x32xf32> to vector<4x32xf32>
    %c0_117 = arith.constant 0 : index
    %c128_118 = arith.constant 128 : index
    %556 = vector.load %arg3[%c0_117, %c128_118] : memref<4x256xf32, #tpu.memory_space<vmem>>, vector<4x32xf32>
    tpu.vector_store %arg3[%c0_117, %c128_118], %555 {strides = array<i32>} : memref<4x256xf32, #tpu.memory_space<vmem>>, vector<4x32xf32>,
    %557 = vector.extract_strided_slice %546 {offsets = [20, 0], sizes = [4, 32], strides = [1, 1]} : vector<32x32xf32> to vector<4x32xf32>
    %c0_119 = arith.constant 0 : index
    %c160 = arith.constant 160 : index
    %558 = vector.load %arg3[%c0_119, %c160] : memref<4x256xf32, #tpu.memory_space<vmem>>, vector<4x32xf32>
    tpu.vector_store %arg3[%c0_119, %c160], %557 {strides = array<i32>} : memref<4x256xf32, #tpu.memory_space<vmem>>, vector<4x32xf32>,
    %559 = vector.extract_strided_slice %546 {offsets = [24, 0], sizes = [4, 32], strides = [1, 1]} : vector<32x32xf32> to vector<4x32xf32>
    %c0_120 = arith.constant 0 : index
    %c192 = arith.constant 192 : index
    %560 = vector.load %arg3[%c0_120, %c192] : memref<4x256xf32, #tpu.memory_space<vmem>>, vector<4x32xf32>
    tpu.vector_store %arg3[%c0_120, %c192], %559 {strides = array<i32>} : memref<4x256xf32, #tpu.memory_space<vmem>>, vector<4x32xf32>,
    %561 = vector.extract_strided_slice %546 {offsets = [28, 0], sizes = [4, 32], strides = [1, 1]} : vector<32x32xf32> to vector<4x32xf32>
    %c0_121 = arith.constant 0 : index
    %c224 = arith.constant 224 : index
    %562 = vector.load %arg3[%c0_121, %c224] : memref<4x256xf32, #tpu.memory_space<vmem>>, vector<4x32xf32>
    tpu.vector_store %arg3[%c0_121, %c224], %561 {strides = array<i32>} : memref<4x256xf32, #tpu.memory_space<vmem>>, vector<4x32xf32>,
    return
  }
}

</mosaic_0001>

<bundles_post_ra>
// kernel: embedder_forward.1
= control target key start
LH: loop header
LB: loop body
LE: loop exit
PB: predicated region body
PF: predicated region fallthrough
CT: control target
= control target key end

     0   :  { %vm46_vm0 = vcmask 1043456   ;;  %vm39_vm1 = vcmask 64512   ;;  %v2074_v0 = vmov 0.0   ;;  %vm2075_vm2 = vmmov 0   ;;  %s2076_s24 = smov 96   ;;  %s2079_s16 = smov 32   ;;  %s2477_s1 = inlined_call_operand.vmem [shape: bf16[192,96], index: 1, kind: input, shape index: {}]   ;;  %s2478_s0 = inlined_call_operand.vmem [shape: bf16[32,8], index: 0, kind: input, shape index: {}]   ;;  %s2479_s2 = inlined_call_operand.vmem [shape: f32[3,128], index: 2, kind: input, shape index: {}]   ;;  %s2480_s3 = inlined_call_operand.vmem [shape: f32[4,256], index: 3, kind: output, shape index: {}]  }
   0x1   :  { %1801 = vmatprep.subr.bf16.mxu1 %v2074_v0  ;;  %v15_v1 = vld [vmem:[%s2477_s1] sm:$0xf]  ;;  %1805 = vmatprep.mubr.msk.bf16.mxu1 %vm2075_vm2, %v2074_v0  ;;  %v2109_v2 = vld [vmem:[%s2477_s1 + $0x10] sm:$0xff]   ;;  %v1954_v5 = vld [vmem:[%s2478_s0 + $0x8] sm:$0xff]   ;;  %v2077_v8 = vmov 0   ;;  %vm191_vm3 = vcmask 254976  }
   0x2   :  { %1945 = vmatprep.subr.msk.bf16.mxu0 %vm46_vm0, %v15_v1  ;;  %v48_v3 = vsel %vm46_vm0, %v15_v1, 0  ;;  %v1953_v4 = vld [vmem:[%s2478_s0] sm:$0xff]   ;;  %1802 = vmatpush3.bf16.msra.mxu1 %v2109_v2  ;;  %v2124_v6 = vld [vmem:[%s2477_s1 + $0x18] sm:$0xff]   ;;  %s2078_s0 = smov 64   ;;  %vm111_vm4 = vcmask 261120   ;;  %vm275_vm5 = vcmask 257026  }
   0x3   :  { %1796 = vmatpush3.bf16.msra.mxu0 %v48_v3  ;;  %1797 = vmatprep.mubr.msk.bf16.mxu0 %vm39_vm1, %v1953_v4  ;;  %v2129_v7 = vld [vmem:[%s2479_s2] ss:$0 sm:$0xff]  ;;  %vm446_vm6 = vcmask 261126   ;;  %vm359_vm7 = vcmask 259076   ;;  %vm1641_vm8 = vcmask 257024   ;;  %vm1648_vm9 = vcmask 519424  }
   0x4   :  { %1809 = vmatprep.subr.bf16.mxu0 %v2074_v0  ;;  %1803 = vmatprep.subr.bf16.mxu1 %v2074_v0  ;;  %vm1654_vm10 = vcmask 781824   ;;  %vm1660_vm11 = vcmask 1044224  }
   0x5   :  { %163 = vrot.lane.b32.xlu0 %v2129_v7, %s2076_s24 }
   0x6   :  { %1798 = vmatmul.mubr.msk.bf16.vlgmr.msra.gmra.mrb[0].mxu0 %vm39_vm1, %v1954_v5  ;;  %1804 = vmatpush3.bf16.msra.mxu1 %v2124_v6 }
   0x7   :  { %1810 = vmatpush3.bf16.msra.mxu0 %v2109_v2  ;;  %1813 = vmatprep.mubr.msk.bf16.mxu0 %vm2075_vm2, %v2074_v0 }
   0x8   :  { %1811 = vmatprep.subr.bf16.mxu0 %v2074_v0  ;;  %1817 = vmatprep.subr.bf16.mxu1 %v2074_v0 }
   0x9   :  { %1806 = vmatmul.mubr.bf16.vlgmr.msra.gmra.mrb[0].mxu1 %v2077_v8 }
   0xa   :  { %1818 = vmatpush3.bf16.msra.mxu1 %v2109_v2  ;;  %1821 = vmatprep.mubr.msk.bf16.mxu1 %vm2075_vm2, %v2074_v0 }
   0xb   :  { %1812 = vmatpush3.bf16.msra.mxu0 %v2124_v6  ;;  %1819 = vmatprep.subr.bf16.mxu1 %v2074_v0 }
   0xc   :  { %1825 = vmatprep.subr.bf16.mxu0 %v2074_v0 }
   0xe   :  { %1820 = vmatpush3.bf16.msra.mxu1 %v2124_v6 }
   0xf   :  { %1833 = vmatprep.subr.bf16.mxu1 %v2074_v0 }
  0x77   :  { %v2153_v12 = vpop.permute.xlu0 %163 }
  0xd9   :  { %v2149_v9 = vpop.f32.mrb[0].mxu0 }
  0xda   :  { %v84_v10 = vpop.f32.mrb[1].mxu0 }
  0xdb   :  { %v2151_v11 = vpop.f32.mrb[2].mxu0  ;;  %v85_v19 = vadd.f32 %v2129_v7, %v84_v10 }
  0xdc   :  { %v2155_v13 = vpop.f32.mrb[3].mxu0  ;;  %v149_v14 = vpop.f32.mrb[0].mxu1 }
  0xdd   :  { %v166_v15 = vadd.f32 %v2153_v12, %v149_v14  ;;  %v1807_v16 = vpop.f32.mrb[1].mxu1  ;;  %v155_v20 = vadd.f32 %v149_v14, %v85_v19  ;;  %v88_v10 = vadd.f32 %v2129_v7, %v2155_v13 }
  0xde   :  { %v152_v17 = vpop.f32.mrb[2].mxu1 }
  0xdf   :  { %168 = vrot.lane.b32.xlu0 %v166_v15, %s2078_s0  ;;  %v1808_v18 = vpop.f32.mrb[3].mxu1  ;;  %v1690_v21 = vmul.f32 -1.442695, %v155_v20 }
  0xe1   :  { %1962 = vpow2.f32 %v1690_v21 }
  0xeb   :  { %v1963_v22 = vpop.eup %1962 }
  0xec   :  { %v159_v23 = vadd.f32 1.0, %v1963_v22 }
  0xee   :  { %1964 = vrcp.f32 %v159_v23 }
  0xf8   :  { %v1965_v24 = vpop.eup %1964 }
  0xf9   :  { %v178_v30 = vsub.f32 1.0, %v1965_v24  ;;  %v184_v32 = vmul.f32 0.0, %v1965_v24 }
 0x151   :  { %v169_v25 = vpop.permute.xlu0 %168 }
 0x152   :  { %v171_v26 = vmul.f32 %v1965_v24, %v169_v25 }
 0x154   :  { %173 = vrot.lane.b32.xlu1 %v171_v26, %s2078_s0 }
 0x1c6   :  { %v174_v27 = vpop.permute.xlu1 %173 }
 0x1c7   :  { %v176_v28 = vadd.f32 %v174_v27, %v85_v19 }
 0x1c9   :  { %1966 = vtanh.f32 %v176_v28 }
 0x1d3   :  { %v1967_v29 = vpop.eup %1966 }
 0x1d4   :  { %180 = vrot.lane.b32.xlu1 %v1967_v29, %s2076_s24 }
 0x246   :  { %v181_v31 = vpop.permute.xlu1 %180 }
 0x247   :  { %v183_v33 = vmul.f32 %v181_v31, %v178_v30 }
 0x249   :  { %v185_v34 = vadd.f32 %v184_v32, %v183_v33 }
 0x24b   :  { %v186_v35 = vpack.c.bf16 %v185_v34, %v185_v34  ;;  %v266_v54 = vrot.slane %v185_v34, 4 }
 0x24d   :  { %188 = vrot.lane.b32.xlu0 %v186_v35, %s2076_s24 }
 0x2bf   :  { %v189_v36 = vpop.permute.xlu0 %188 }
 0x2c0   :  { %192 = vst.msk [vmem:[#allocation2] sm:$0x3] %vm191_vm3, %v189_v36  ;;  %1814 = vmatmul.mubr.msk.bf16.vlgmr.msra.gmra.mrb[4].mxu0 %vm111_vm4, %v189_v36 }
 0x2c1   :  { %1826 = vmatpush3.bf16.msra.mxu0 %v2109_v2  ;;  %1829 = vmatprep.mubr.msk.bf16.mxu0 %vm2075_vm2, %v2074_v0 }
 0x2c2   :  { %1827 = vmatprep.subr.bf16.mxu0 %v2074_v0 }
 0x2c5   :  { %1828 = vmatpush3.bf16.msra.mxu0 %v2124_v6 }
 0x2c6   :  { %1841 = vmatprep.subr.bf16.mxu0 %v2074_v0 }
 0x393   :  { %v230_v37 = vpop.f32.mrb[4].mxu0 }
 0x394   :  { %v246_v38 = vadd.f32 %v230_v37, %v2153_v12  ;;  %v1815_v39 = vpop.f32.mrb[5].mxu0  ;;  %v237_v43 = vrot.slane %v230_v37, 4 }
 0x395   :  { %v233_v40 = vpop.f32.mrb[6].mxu0 }
 0x396   :  { %v248_v41 = vrot.slane %v246_v38, 4  ;;  %v1816_v42 = vpop.f32.mrb[7].mxu0  ;;  %v239_v44 = vadd.f32 %v237_v43, %v85_v19 }
 0x398   :  { %249 = vrot.lane.b32.xlu1 %v248_v41, %s2078_s0  ;;  %v1692_v45 = vmul.f32 -1.442695, %v239_v44 }
 0x39a   :  { %1968 = vpow2.f32 %v1692_v45 }
 0x3a4   :  { %v1969_v46 = vpop.eup %1968 }
 0x3a5   :  { %v243_v47 = vadd.f32 1.0, %v1969_v46 }
 0x3a7   :  { %1970 = vrcp.f32 %v243_v47 }
 0x3b1   :  { %v1971_v48 = vpop.eup %1970 }
 0x3b2   :  { %v259_v55 = vsub.f32 1.0, %v1971_v48  ;;  %v268_v57 = vmul.f32 %v1971_v48, %v266_v54 }
 0x40a   :  { %v250_v49 = vpop.permute.xlu1 %249 }
 0x40b   :  { %v252_v50 = vmul.f32 %v1971_v48, %v250_v49 }
 0x40d   :  { %254 = vrot.lane.b32.xlu0 %v252_v50, %s2078_s0 }
 0x47f   :  { %v255_v51 = vpop.permute.xlu0 %254 }
 0x480   :  { %v257_v52 = vadd.f32 %v255_v51, %v85_v19 }
 0x482   :  { %1972 = vtanh.f32 %v257_v52 }
 0x48c   :  { %v1973_v53 = vpop.eup %1972 }
 0x48d   :  { %261 = vrot.lane.b32.xlu1 %v1973_v53, %s2076_s24 }
 0x4ff   :  { %v262_v56 = vpop.permute.xlu1 %261 }
 0x500   :  { %v264_v58 = vmul.f32 %v262_v56, %v259_v55 }
 0x502   :  { %v269_v59 = vadd.f32 %v268_v57, %v264_v58 }
 0x504   :  { %v2175_v60 = vpack.c.bf16 %v269_v59, %v269_v59  ;;  %v349_v24 = vrot.slane %v269_v59, 4 }
 0x506   :  { %v277_v61 = vrot.slane %v2175_v60, 2 }
 0x508   :  { %278 = vrot.lane.b32.xlu0 %v277_v61, %s2076_s24 }
 0x57a   :  { %v279_v62 = vpop.permute.xlu0 %278 }
 0x57b   :  { %1822 = vmatmul.mubr.msk.bf16.vlgmr.msra.gmra.mrb[4].mxu1 %vm111_vm4, %v279_v62 }
 0x57c   :  { %1834 = vmatpush3.bf16.msra.mxu1 %v2109_v2  ;;  %1837 = vmatprep.mubr.msk.bf16.mxu1 %vm2075_vm2, %v2074_v0 }
 0x57d   :  { %1835 = vmatprep.subr.bf16.mxu1 %v2074_v0 }
 0x580   :  { %1836 = vmatpush3.bf16.msra.mxu1 %v2124_v6 }
 0x581   :  { %1849 = vmatprep.subr.bf16.mxu1 %v2074_v0 }
 0x64e   :  { %v317_v63 = vpop.f32.mrb[4].mxu1 }
 0x64f   :  { %v330_v1 = vadd.f32 %v317_v63, %v2153_v12  ;;  %v1823_v3 = vpop.f32.mrb[5].mxu1  ;;  %v323_v14 = vadd.f32 %v317_v63, %v88_v10  ;;  %v93_v63 = vadd.f32 %v2149_v9, %v2129_v7 }
 0x650   :  { %v320_v4 = vpop.f32.mrb[6].mxu1 }
 0x651   :  { %332 = vrot.lane.b32.xlu1 %v330_v1, %s2078_s0  ;;  %v1824_v5 = vpop.f32.mrb[7].mxu1  ;;  %v1694_v15 = vmul.f32 -1.442695, %v323_v14 }
 0x653   :  { %1974 = vpow2.f32 %v1694_v15 }
 0x65d   :  { %v1975_v16 = vpop.eup %1974 }
 0x65e   :  { %v327_v17 = vadd.f32 1.0, %v1975_v16 }
 0x660   :  { %1976 = vrcp.f32 %v327_v17 }
 0x66a   :  { %v1977_v18 = vpop.eup %1976 }
 0x66b   :  { %v342_v25 = vsub.f32 1.0, %v1977_v18  ;;  %v351_v26 = vmul.f32 %v1977_v18, %v349_v24 }
 0x6c3   :  { %v333_v19 = vpop.permute.xlu1 %332 }
 0x6c4   :  { %v335_v20 = vmul.f32 %v1977_v18, %v333_v19 }
 0x6c6   :  { %337 = vrot.lane.b32.xlu0 %v335_v20, %s2078_s0 }
 0x738   :  { %v338_v21 = vpop.permute.xlu0 %337 }
 0x739   :  { %v340_v22 = vadd.f32 %v338_v21, %v88_v10 }
 0x73b   :  { %1978 = vtanh.f32 %v340_v22 }
 0x745   :  { %v1979_v23 = vpop.eup %1978 }
 0x746   :  { %344 = vrot.lane.b32.xlu1 %v1979_v23, %s2076_s24 }
 0x7b8   :  { %v345_v13 = vpop.permute.xlu1 %344 }
 0x7b9   :  { %v347_v27 = vmul.f32 %v345_v13, %v342_v25 }
 0x7bb   :  { %v352_v28 = vadd.f32 %v351_v26, %v347_v27 }
 0x7bd   :  { %v2192_v29 = vpack.c.bf16 %v352_v28, %v352_v28  ;;  %v436_v48 = vrot.slane %v352_v28, 4 }
 0x7bf   :  { %361 = vrot.lane.b32.xlu0 %v2192_v29, %s2076_s24 }
 0x831   :  { %v362_v30 = vpop.permute.xlu0 %361 }
 0x832   :  { %1830 = vmatmul.mubr.msk.bf16.vlgmr.msra.gmra.mrb[8].mxu0 %vm111_vm4, %v362_v30 }
 0x833   :  { %1842 = vmatpush3.bf16.msra.mxu0 %v2109_v2  ;;  %1845 = vmatprep.mubr.msk.bf16.mxu0 %vm2075_vm2, %v2074_v0 }
 0x834   :  { %1843 = vmatprep.subr.bf16.mxu0 %v2074_v0 }
 0x837   :  { %1844 = vmatpush3.bf16.msra.mxu0 %v2124_v6 }
 0x838   :  { %1857 = vmatprep.subr.bf16.mxu0 %v2074_v0 }
 0x905   :  { %v400_v31 = vpop.f32.mrb[8].mxu0 }
 0x906   :  { %v416_v32 = vadd.f32 %v400_v31, %v2153_v12  ;;  %v1831_v33 = vpop.f32.mrb[9].mxu0  ;;  %v407_v37 = vrot.slane %v400_v31, 4 }
 0x907   :  { %v403_v34 = vpop.f32.mrb[10].mxu0 }
 0x908   :  { %v418_v35 = vrot.slane %v416_v32, 4  ;;  %v1832_v36 = vpop.f32.mrb[11].mxu0  ;;  %v409_v38 = vadd.f32 %v407_v37, %v88_v10 }
 0x90a   :  { %419 = vrot.lane.b32.xlu1 %v418_v35, %s2078_s0  ;;  %v1696_v39 = vmul.f32 -1.442695, %v409_v38 }
 0x90c   :  { %1980 = vpow2.f32 %v1696_v39 }
 0x916   :  { %v1981_v40 = vpop.eup %1980 }
 0x917   :  { %v413_v41 = vadd.f32 1.0, %v1981_v40 }
 0x919   :  { %1982 = vrcp.f32 %v413_v41 }
 0x923   :  { %v1983_v42 = vpop.eup %1982 }
 0x924   :  { %v429_v49 = vsub.f32 1.0, %v1983_v42  ;;  %v438_v51 = vmul.f32 %v1983_v42, %v436_v48 }
 0x97c   :  { %v420_v43 = vpop.permute.xlu1 %419 }
 0x97d   :  { %v422_v44 = vmul.f32 %v1983_v42, %v420_v43 }
 0x97f   :  { %424 = vrot.lane.b32.xlu0 %v422_v44, %s2078_s0 }
 0x9f1   :  { %v425_v45 = vpop.permute.xlu0 %424 }
 0x9f2   :  { %v427_v46 = vadd.f32 %v425_v45, %v88_v10 }
 0x9f4   :  { %1984 = vtanh.f32 %v427_v46 }
 0x9fe   :  { %v1985_v47 = vpop.eup %1984 }
 0x9ff   :  { %431 = vrot.lane.b32.xlu1 %v1985_v47, %s2076_s24 }
 0xa71   :  { %v432_v50 = vpop.permute.xlu1 %431 }
 0xa72   :  { %v434_v52 = vmul.f32 %v432_v50, %v429_v49 }
 0xa74   :  { %v439_v53 = vadd.f32 %v438_v51, %v434_v52 }
 0xa76   :  { %v2207_v54 = vpack.c.bf16 %v439_v53, %v439_v53  ;;  %v520_v19 = vrot.slane %v439_v53, 4 }
 0xa78   :  { %v448_v55 = vrot.slane %v2207_v54, 2 }
 0xa7a   :  { %449 = vrot.lane.b32.xlu0 %v448_v55, %s2076_s24 }
 0xaec   :  { %v450_v56 = vpop.permute.xlu0 %449 }
 0xaed   :  { %1838 = vmatmul.mubr.msk.bf16.vlgmr.msra.gmra.mrb[8].mxu1 %vm111_vm4, %v450_v56  ;;  %v96_v56 = vadd.f32 %v2151_v11, %v2129_v7 }
 0xaee   :  { %1850 = vmatpush3.bf16.msra.mxu1 %v2109_v2  ;;  %1853 = vmatprep.mubr.msk.bf16.mxu1 %vm2075_vm2, %v2074_v0 }
 0xaef   :  { %1851 = vmatprep.subr.bf16.mxu1 %v2074_v0 }
 0xaf2   :  { %1852 = vmatpush3.bf16.msra.mxu1 %v2124_v6 }
 0xbc0   :  { %v488_v57 = vpop.f32.mrb[8].mxu1 }
 0xbc1   :  { %v501_v58 = vadd.f32 %v488_v57, %v2153_v12  ;;  %v1839_v59 = vpop.f32.mrb[9].mxu1  ;;  %v494_v1 = vadd.f32 %v488_v57, %v93_v63 }
 0xbc2   :  { %v491_v61 = vpop.f32.mrb[10].mxu1 }
 0xbc3   :  { %503 = vrot.lane.b32.xlu1 %v501_v58, %s2078_s0  ;;  %v1840_v62 = vpop.f32.mrb[11].mxu1  ;;  %v1698_v3 = vmul.f32 -1.442695, %v494_v1 }
 0xbc5   :  { %1986 = vpow2.f32 %v1698_v3 }
 0xbcf   :  { %v1987_v4 = vpop.eup %1986 }
 0xbd0   :  { %v498_v5 = vadd.f32 1.0, %v1987_v4 }
 0xbd2   :  { %1988 = vrcp.f32 %v498_v5 }
 0xbdc   :  { %v1989_v10 = vpop.eup %1988 }
 0xbdd   :  { %v513_v20 = vsub.f32 1.0, %v1989_v10  ;;  %v522_v21 = vmul.f32 %v1989_v10, %v520_v19 }
 0xc35   :  { %v504_v14 = vpop.permute.xlu1 %503 }
 0xc36   :  { %v506_v15 = vmul.f32 %v1989_v10, %v504_v14 }
 0xc38   :  { %508 = vrot.lane.b32.xlu0 %v506_v15, %s2078_s0 }
 0xcaa   :  { %v509_v16 = vpop.permute.xlu0 %508 }
 0xcab   :  { %v511_v17 = vadd.f32 %v509_v16, %v93_v63 }
 0xcad   :  { %1990 = vtanh.f32 %v511_v17 }
 0xcb7   :  { %v1991_v18 = vpop.eup %1990 }
 0xcb8   :  { %515 = vrot.lane.b32.xlu1 %v1991_v18, %s2076_s24 }
 0xd2a   :  { %v516_v9 = vpop.permute.xlu1 %515 }
 0xd2b   :  { %v518_v22 = vmul.f32 %v516_v9, %v513_v20 }
 0xd2d   :  { %v523_v23 = vadd.f32 %v522_v21, %v518_v22 }
 0xd2f   :  { %v524_v24 = vpack.c.bf16 %v523_v23, %v523_v23  ;;  %v603_v41 = vrot.slane %v523_v23, 4 }
 0xd31   :  { %526 = vrot.lane.b32.xlu0 %v524_v24, %s2076_s24 }
 0xda3   :  { %v527_v25 = vpop.permute.xlu0 %526 }
 0xda4   :  { %529 = vst.msk [vmem:[#allocation2 + $0x8] sm:$0x3] %vm191_vm3, %v527_v25  ;;  %1846 = vmatmul.mubr.msk.bf16.vlgmr.msra.gmra.mrb[12].mxu0 %vm111_vm4, %v527_v25 }
 0xda5   :  { %1858 = vmatpush3.bf16.msra.mxu0 %v2109_v2  ;;  %1861 = vmatprep.mubr.msk.bf16.mxu0 %vm2075_vm2, %v2074_v0 }
 0xda6   :  { %1859 = vmatprep.subr.bf16.mxu0 %v2074_v0 }
 0xda9   :  { %1860 = vmatpush3.bf16.msra.mxu0 %v2124_v6 }
 0xdaa   :  { %1873 = vmatprep.subr.bf16.mxu0 %v2074_v0 }
 0xe77   :  { %v567_v13 = vpop.f32.mrb[12].mxu0 }
 0xe78   :  { %v583_v26 = vadd.f32 %v567_v13, %v2153_v12  ;;  %v1847_v27 = vpop.f32.mrb[13].mxu0  ;;  %v574_v32 = vrot.slane %v567_v13, 4 }
 0xe79   :  { %v570_v28 = vpop.f32.mrb[14].mxu0 }
 0xe7a   :  { %v585_v30 = vrot.slane %v583_v26, 4  ;;  %v1848_v31 = vpop.f32.mrb[15].mxu0  ;;  %v576_v2 = vadd.f32 %v574_v32, %v93_v63 }
 0xe7c   :  { %586 = vrot.lane.b32.xlu1 %v585_v30, %s2078_s0  ;;  %v1700_v33 = vmul.f32 -1.442695, %v576_v2 }
 0xe7e   :  { %1992 = vpow2.f32 %v1700_v33 }
 0xe88   :  { %v1993_v34 = vpop.eup %1992 }
 0xe89   :  { %v580_v35 = vadd.f32 1.0, %v1993_v34 }
 0xe8b   :  { %1994 = vrcp.f32 %v580_v35 }
 0xe95   :  { %v1995_v36 = vpop.eup %1994 }
 0xe96   :  { %v596_v42 = vsub.f32 1.0, %v1995_v36  ;;  %v605_v44 = vmul.f32 %v1995_v36, %v603_v41 }
 0xeee   :  { %v587_v6 = vpop.permute.xlu1 %586 }
 0xeef   :  { %v589_v37 = vmul.f32 %v1995_v36, %v587_v6  ;;  %v1958_v6 = vld [vmem:[%s2477_s1 + $0x20] sm:$0xff]  }
 0xef0   :  { %1865 = vmatprep.subr.bf16.mxu1 %v1958_v6 }
 0xef1   :  { %591 = vrot.lane.b32.xlu0 %v589_v37, %s2078_s0  ;;  %v2279_v37 = vld [vmem:[%s2477_s1 + $0x38] sm:$0xff]  }
 0xf63   :  { %v592_v38 = vpop.permute.xlu0 %591 }
 0xf64   :  { %v594_v39 = vadd.f32 %v592_v38, %v93_v63  ;;  %v355_v38 = vrot.slane %v2192_v29, 4  ;;  %v1959_v29 = vld [vmem:[%s2477_s1 + $0x28] sm:$0xff]  }
 0xf66   :  { %1996 = vtanh.f32 %v594_v39 }
 0xf70   :  { %v1997_v40 = vpop.eup %1996 }
 0xf71   :  { %598 = vrot.lane.b32.xlu1 %v1997_v40, %s2076_s24 }
 0xfe3   :  { %v599_v43 = vpop.permute.xlu1 %598 }
 0xfe4   :  { %v601_v45 = vmul.f32 %v599_v43, %v596_v42 }
 0xfe6   :  { %v606_v46 = vadd.f32 %v605_v44, %v601_v45  ;;  %v2303_v45 = vld [vmem:[%s2479_s2 + $0x1] ss:$0 sm:$0xff] }
 0xfe8   :  { %v2236_v47 = vpack.c.bf16 %v606_v46, %v606_v46  ;;  %v685_v10 = vrot.slane %v606_v46, 4 }
 0xfea   :  { %v613_v48 = vrot.slane %v2236_v47, 2 }
 0xfec   :  { %614 = vrot.lane.b32.xlu0 %v613_v48, %s2076_s24 }
0x105e   :  { %v615_v49 = vpop.permute.xlu0 %614 }
0x105f   :  { %1854 = vmatmul.mubr.msk.bf16.vlgmr.msra.gmra.mrb[12].mxu1 %vm111_vm4, %v615_v49 }
0x1060   :  { %1866 = vmatpush3.bf16.msra.mxu1 %v1958_v6 }
0x1061   :  { %1867 = vmatprep.subr.bf16.mxu1 %v1959_v29 }
0x1064   :  { %1868 = vmatpush3.bf16.msra.mxu1 %v1959_v29 }
0x1065   :  { %1881 = vmatprep.subr.bf16.mxu1 %v2074_v0 }
0x1132   :  { %v653_v50 = vpop.f32.mrb[12].mxu1 }
0x1133   :  { %v666_v51 = vadd.f32 %v653_v50, %v2153_v12  ;;  %v1855_v52 = vpop.f32.mrb[13].mxu1  ;;  %v659_v57 = vadd.f32 %v653_v50, %v96_v56 }
0x1134   :  { %v656_v53 = vpop.f32.mrb[14].mxu1 }
0x1135   :  { %668 = vrot.lane.b32.xlu1 %v666_v51, %s2078_s0  ;;  %v1856_v55 = vpop.f32.mrb[15].mxu1  ;;  %v1702_v58 = vmul.f32 -1.442695, %v659_v57 }
0x1137   :  { %1998 = vpow2.f32 %v1702_v58 }
0x1141   :  { %v1999_v59 = vpop.eup %1998 }
0x1142   :  { %v663_v61 = vadd.f32 1.0, %v1999_v59 }
0x1144   :  { %2000 = vrcp.f32 %v663_v61 }
0x114e   :  { %v2001_v62 = vpop.eup %2000 }
0x114f   :  { %v678_v14 = vsub.f32 1.0, %v2001_v62  ;;  %v687_v11 = vmul.f32 %v2001_v62, %v685_v10 }
0x11a7   :  { %v669_v63 = vpop.permute.xlu1 %668 }
0x11a8   :  { %v671_v1 = vmul.f32 %v2001_v62, %v669_v63 }
0x11aa   :  { %673 = vrot.lane.b32.xlu0 %v671_v1, %s2078_s0 }
0x121c   :  { %v674_v3 = vpop.permute.xlu0 %673 }
0x121d   :  { %v676_v4 = vadd.f32 %v674_v3, %v96_v56 }
0x121f   :  { %2002 = vtanh.f32 %v676_v4 }
0x1229   :  { %v2003_v5 = vpop.eup %2002 }
0x122a   :  { %680 = vrot.lane.b32.xlu1 %v2003_v5, %s2076_s24 }
0x129c   :  { %v681_v7 = vpop.permute.xlu1 %680 }
0x129d   :  { %v683_v15 = vmul.f32 %v681_v7, %v678_v14 }
0x129f   :  { %v2247_v16 = vadd.f32 %v687_v11, %v683_v15 }
0x12a1   :  { %v689_v17 = vpack.c.bf16 %v2247_v16, %v2247_v16  ;;  %v771_v39 = vrot.slane %v2247_v16, 4 }
0x12a3   :  { %696 = vrot.lane.b32.xlu0 %v689_v17, %s2076_s24  ;;  %v691_v32 = vrot.slane %v689_v17, 4 }
0x1315   :  { %v697_v18 = vpop.permute.xlu0 %696 }
0x1316   :  { %1862 = vmatmul.mubr.msk.bf16.vlgmr.msra.gmra.mrb[16].mxu0 %vm111_vm4, %v697_v18 }
0x1317   :  { %1877 = vmatprep.mubr.msk.bf16.mxu0 %vm2075_vm2, %v2074_v0 }
0x13e9   :  { %v735_v19 = vpop.f32.mrb[16].mxu0 }
0x13ea   :  { %v751_v20 = vadd.f32 %v735_v19, %v2153_v12  ;;  %v1863_v9 = vpop.f32.mrb[17].mxu0  ;;  %v742_v24 = vrot.slane %v735_v19, 4  ;;  %v442_v12 = vrot.slane %v2207_v54, 4  ;;  %v2269_v54 = vld [vmem:[%s2477_s1 + $0x30] sm:$0xff]  }
0x13eb   :  { %v738_v21 = vpop.f32.mrb[18].mxu0  ;;  %1874 = vmatpush3.bf16.msra.mxu0 %v2269_v54 }
0x13ec   :  { %v753_v22 = vrot.slane %v751_v20, 4  ;;  %v1864_v23 = vpop.f32.mrb[19].mxu0  ;;  %v744_v25 = vadd.f32 %v742_v24, %v96_v56  ;;  %1875 = vmatprep.subr.bf16.mxu0 %v2074_v0 }
0x13ee   :  { %754 = vrot.lane.b32.xlu1 %v753_v22, %s2078_s0  ;;  %v1704_v13 = vmul.f32 -1.442695, %v744_v25 }
0x13ef   :  { %1876 = vmatpush3.bf16.msra.mxu0 %v2279_v37 }
0x13f0   :  { %2004 = vpow2.f32 %v1704_v13  ;;  %1889 = vmatprep.subr.bf16.mxu0 %v2074_v0 }
0x13f2   :  { %1878 = vmatmul.mubr.bf16.vlgmr.msra.gmra.mrb[20].mxu0 %v2077_v8 }
0x13f3   :  { %1890 = vmatpush3.bf16.msra.mxu0 %v2269_v54  ;;  %1893 = vmatprep.mubr.msk.bf16.mxu0 %vm2075_vm2, %v2074_v0 }
0x13f4   :  { %1891 = vmatprep.subr.bf16.mxu0 %v2074_v0 }
0x13f7   :  { %1892 = vmatpush3.bf16.msra.mxu0 %v2279_v37 }
0x13f8   :  { %1905 = vmatprep.subr.bf16.mxu0 %v2074_v0 }
0x13fa   :  { %v2005_v26 = vpop.eup %2004 }
0x13fb   :  { %v748_v27 = vadd.f32 1.0, %v2005_v26 }
0x13fd   :  { %2006 = vrcp.f32 %v748_v27 }
0x1407   :  { %v2007_v28 = vpop.eup %2006 }
0x1408   :  { %v764_v40 = vsub.f32 1.0, %v2007_v28  ;;  %v773_v41 = vmul.f32 %v2007_v28, %v771_v39 }
0x1460   :  { %v755_v30 = vpop.permute.xlu1 %754 }
0x1461   :  { %v757_v31 = vmul.f32 %v2007_v28, %v755_v30 }
0x1463   :  { %759 = vrot.lane.b32.xlu0 %v757_v31, %s2078_s0 }
0x1467   :  { %272 = vrot.lane.b32.xlu0 %v2175_v60, %s2076_s24 }
0x146b   :  { %443 = vrot.lane.b32.xlu0 %v442_v12, %s2076_s24 }
0x146f   :  { %692 = vrot.lane.b32.xlu0 %v691_v32, %s2076_s24 }
0x1473   :  { %924 = vrot.lane.b32.xlu0 %v2303_v45, %s2076_s24 }
0x14c5   :  { %v910_v50 = vpop.f32.mrb[20].mxu0 }
0x14c6   :  { %v1879_v51 = vpop.f32.mrb[21].mxu0 }
0x14c7   :  { %v913_v52 = vpop.f32.mrb[22].mxu0 }
0x14c8   :  { %v1880_v53 = vpop.f32.mrb[23].mxu0 }
0x14d5   :  { %v760_v2 = vpop.permute.xlu0 %759 }
0x14d6   :  { %v762_v33 = vadd.f32 %v760_v2, %v96_v56 }
0x14d8   :  { %2008 = vtanh.f32 %v762_v33 }
0x14d9   :  { %v273_v34 = vpop.permute.xlu0 %272 }
0x14da   :  { %276 = vst.msk [vmem:[#allocation2] sm:$0xc] %vm275_vm5, %v273_v34 }
0x14dd   :  { %v444_v35 = vpop.permute.xlu0 %443 }
0x14de   :  { %447 = vst.msk [vmem:[#allocation2] sm:$0xc0] %vm446_vm6, %v444_v35 }
0x14e1   :  { %v693_v60 = vpop.permute.xlu0 %692 }
0x14e2   :  { %v2009_v36 = vpop.eup %2008  ;;  %695 = vst.msk [vmem:[#allocation2 + $0x8] sm:$0x30] %vm359_vm7, %v693_v60 }
0x14e3   :  { %766 = vrot.lane.b32.xlu1 %v2009_v36, %s2076_s24 }
0x14e5   :  { %v2311_v55 = vpop.permute.xlu0 %924 }
0x14e6   :  { %v927_v56 = vadd.f32 %v2311_v55, %v910_v50 }
0x14e7   :  { %356 = vrot.lane.b32.xlu1 %v355_v38, %s2076_s24 }
0x14eb   :  { %609 = vrot.lane.b32.xlu1 %v2236_v47, %s2076_s24 }
0x1555   :  { %v767_v8 = vpop.permute.xlu1 %766 }
0x1556   :  { %v769_v42 = vmul.f32 %v767_v8, %v764_v40 }
0x1558   :  { %v774_v43 = vadd.f32 %v773_v41, %v769_v42 }
0x1559   :  { %v357_v44 = vpop.permute.xlu1 %356 }
0x155a   :  { %v775_v46 = vpack.c.bf16 %v774_v43, %v774_v43  ;;  %360 = vst.msk [vmem:[#allocation2] sm:$0x30] %vm359_vm7, %v357_v44 }
0x155c   :  { %v777_v47 = vrot.slane %v775_v46, 4 }
0x155d   :  { %v610_v48 = vpop.permute.xlu1 %609 }
0x155e   :  { %612 = vst.msk [vmem:[#allocation2 + $0x8] sm:$0xc] %vm275_vm5, %v610_v48  ;;  %778 = vrot.lane.b32.xlu1 %v777_v47, %s2076_s24 }
0x1561   :  { %v795_v49 = vld [vmem:[#allocation2] sm:$0xff] }
0x1562   :  { %1869 = vmatprep.mubr.msk.bf16.mxu1 %vm111_vm4, %v795_v49  ;;  %929 = vrot.lane.b32.xlu1 %v927_v56, %s2078_s0 }
0x15d0   :  { %v779_v57 = vpop.permute.xlu1 %778 }
0x15d1   :  { %781 = vst.msk [vmem:[#allocation2 + $0x8] sm:$0xc0] %vm446_vm6, %v779_v57 }
0x15d4   :  { %v930_v14 = vpop.permute.xlu1 %929 }
0x15d8   :  { %v796_v58 = vld [vmem:[#allocation2 + $0x8] sm:$0xff] }
0x15d9   :  { %1870 = vmatmul.mubr.msk.bf16.vlgmr.msra.gmra.mrb[16].mxu1 %vm111_vm4, %v796_v58 }
0x15da   :  { %1882 = vmatpush3.bf16.msra.mxu1 %v2269_v54  ;;  %1885 = vmatprep.mubr.msk.bf16.mxu1 %vm2075_vm2, %v2074_v0 }
0x15db   :  { %1883 = vmatprep.subr.bf16.mxu1 %v2074_v0 }
0x15de   :  { %1884 = vmatpush3.bf16.msra.mxu1 %v2279_v37 }
0x15df   :  { %1897 = vmatprep.subr.bf16.mxu1 %v2074_v0 }
0x16ac   :  { %v2323_v59 = vpop.f32.mrb[16].mxu1 }
0x16ad   :  { %v849_v61 = vpop.f32.mrb[17].mxu1 }
0x16ae   :  { %v850_v62 = vadd.f32 %v2303_v45, %v849_v61  ;;  %v2326_v63 = vpop.f32.mrb[18].mxu1 }
0x16af   :  { %v2328_v1 = vpop.f32.mrb[19].mxu1 }
0x16b0   :  { %v916_v3 = vadd.f32 %v910_v50, %v850_v62  ;;  %v853_v51 = vadd.f32 %v2303_v45, %v2328_v1 }
0x16b2   :  { %v1712_v4 = vmul.f32 -1.442695, %v916_v3 }
0x16b4   :  { %2010 = vpow2.f32 %v1712_v4 }
0x16be   :  { %v2011_v5 = vpop.eup %2010 }
0x16bf   :  { %v920_v10 = vadd.f32 1.0, %v2011_v5 }
0x16c1   :  { %2012 = vrcp.f32 %v920_v10 }
0x16cb   :  { %v2013_v7 = vpop.eup %2012 }
0x16cc   :  { %v932_v11 = vmul.f32 %v2013_v7, %v930_v14  ;;  %v939_v18 = vsub.f32 1.0, %v2013_v7  ;;  %v945_v20 = vmul.f32 0.0, %v2013_v7 }
0x16ce   :  { %934 = vrot.lane.b32.xlu0 %v932_v11, %s2078_s0 }
0x1740   :  { %v935_v15 = vpop.permute.xlu0 %934 }
0x1741   :  { %v937_v16 = vadd.f32 %v935_v15, %v850_v62 }
0x1743   :  { %2014 = vtanh.f32 %v937_v16 }
0x174d   :  { %v2015_v17 = vpop.eup %2014 }
0x174e   :  { %941 = vrot.lane.b32.xlu1 %v2015_v17, %s2076_s24 }
0x17c0   :  { %v942_v19 = vpop.permute.xlu1 %941 }
0x17c1   :  { %v944_v9 = vmul.f32 %v942_v19, %v939_v18 }
0x17c3   :  { %v946_v21 = vadd.f32 %v945_v20, %v944_v9 }
0x17c5   :  { %v947_v22 = vpack.c.bf16 %v946_v21, %v946_v21  ;;  %v1026_v38 = vrot.slane %v946_v21, 4 }
0x17c7   :  { %949 = vrot.lane.b32.xlu0 %v947_v22, %s2076_s24 }
0x1839   :  { %v950_v23 = vpop.permute.xlu0 %949 }
0x183a   :  { %952 = vst.msk [vmem:[#allocation2] sm:$0x3] %vm191_vm3, %v950_v23  ;;  %1886 = vmatmul.mubr.msk.bf16.vlgmr.msra.gmra.mrb[20].mxu1 %vm111_vm4, %v950_v23 }
0x183b   :  { %1898 = vmatpush3.bf16.msra.mxu1 %v2269_v54  ;;  %1901 = vmatprep.mubr.msk.bf16.mxu1 %vm2075_vm2, %v2074_v0 }
0x183c   :  { %1899 = vmatprep.subr.bf16.mxu1 %v2074_v0 }
0x183f   :  { %1900 = vmatpush3.bf16.msra.mxu1 %v2279_v37 }
0x1840   :  { %1913 = vmatprep.subr.bf16.mxu1 %v2074_v0 }
0x190d   :  { %v990_v24 = vpop.f32.mrb[20].mxu1 }
0x190e   :  { %v1006_v25 = vadd.f32 %v990_v24, %v2311_v55  ;;  %v1887_v13 = vpop.f32.mrb[21].mxu1  ;;  %v997_v30 = vrot.slane %v990_v24, 4 }
0x190f   :  { %v993_v26 = vpop.f32.mrb[22].mxu1 }
0x1910   :  { %v1008_v27 = vrot.slane %v1006_v25, 4  ;;  %v1888_v28 = vpop.f32.mrb[23].mxu1  ;;  %v999_v31 = vadd.f32 %v997_v30, %v850_v62 }
0x1912   :  { %1009 = vrot.lane.b32.xlu1 %v1008_v27, %s2078_s0  ;;  %v1714_v12 = vmul.f32 -1.442695, %v999_v31 }
0x1914   :  { %2016 = vpow2.f32 %v1714_v12 }
0x191e   :  { %v2017_v32 = vpop.eup %2016 }
0x191f   :  { %v1003_v2 = vadd.f32 1.0, %v2017_v32 }
0x1921   :  { %2018 = vrcp.f32 %v1003_v2 }
0x192b   :  { %v2019_v33 = vpop.eup %2018 }
0x192c   :  { %v1019_v29 = vsub.f32 1.0, %v2019_v33  ;;  %v1028_v40 = vmul.f32 %v2019_v33, %v1026_v38 }
0x1984   :  { %v1010_v34 = vpop.permute.xlu1 %1009 }
0x1985   :  { %v1012_v35 = vmul.f32 %v2019_v33, %v1010_v34 }
0x1987   :  { %1014 = vrot.lane.b32.xlu0 %v1012_v35, %s2078_s0 }
0x19f9   :  { %v1015_v60 = vpop.permute.xlu0 %1014 }
0x19fa   :  { %v1017_v36 = vadd.f32 %v1015_v60, %v850_v62 }
0x19fc   :  { %2020 = vtanh.f32 %v1017_v36 }
0x1a06   :  { %v2021_v6 = vpop.eup %2020 }
0x1a07   :  { %1021 = vrot.lane.b32.xlu1 %v2021_v6, %s2076_s24 }
0x1a79   :  { %v1022_v39 = vpop.permute.xlu1 %1021 }
0x1a7a   :  { %v1024_v8 = vmul.f32 %v1022_v39, %v1019_v29 }
0x1a7c   :  { %v1029_v41 = vadd.f32 %v1028_v40, %v1024_v8 }
0x1a7e   :  { %v2345_v42 = vpack.c.bf16 %v1029_v41, %v1029_v41  ;;  %v1108_v10 = vrot.slane %v1029_v41, 4 }
0x1a80   :  { %v1036_v43 = vrot.slane %v2345_v42, 2 }
0x1a82   :  { %1037 = vrot.lane.b32.xlu0 %v1036_v43, %s2076_s24 }
0x1af4   :  { %v1038_v44 = vpop.permute.xlu0 %1037 }
0x1af5   :  { %1894 = vmatmul.mubr.msk.bf16.vlgmr.msra.gmra.mrb[24].mxu0 %vm111_vm4, %v1038_v44  ;;  %v858_v44 = vadd.f32 %v2323_v59, %v2303_v45 }
0x1af6   :  { %1906 = vmatpush3.bf16.msra.mxu0 %v2269_v54  ;;  %1909 = vmatprep.mubr.msk.bf16.mxu0 %vm2075_vm2, %v2074_v0 }
0x1af7   :  { %1907 = vmatprep.subr.bf16.mxu0 %v2074_v0 }
0x1afa   :  { %1908 = vmatpush3.bf16.msra.mxu0 %v2279_v37 }
0x1afb   :  { %1921 = vmatprep.subr.bf16.mxu0 %v2074_v0 }
0x1bc8   :  { %v1076_v46 = vpop.f32.mrb[24].mxu0 }
0x1bc9   :  { %v1089_v47 = vadd.f32 %v1076_v46, %v2311_v55  ;;  %v1895_v48 = vpop.f32.mrb[25].mxu0  ;;  %v1082_v52 = vadd.f32 %v1076_v46, %v853_v51 }
0x1bca   :  { %v1079_v49 = vpop.f32.mrb[26].mxu0 }
0x1bcb   :  { %1091 = vrot.lane.b32.xlu1 %v1089_v47, %s2078_s0  ;;  %v1896_v50 = vpop.f32.mrb[27].mxu0  ;;  %v1716_v53 = vmul.f32 -1.442695, %v1082_v52 }
0x1bcd   :  { %2022 = vpow2.f32 %v1716_v53 }
0x1bd7   :  { %v2023_v56 = vpop.eup %2022 }
0x1bd8   :  { %v1086_v57 = vadd.f32 1.0, %v2023_v56 }
0x1bda   :  { %2024 = vrcp.f32 %v1086_v57 }
0x1be4   :  { %v2025_v58 = vpop.eup %2024 }
0x1be5   :  { %v1101_v14 = vsub.f32 1.0, %v2025_v58  ;;  %v1110_v7 = vmul.f32 %v2025_v58, %v1108_v10 }
0x1c3d   :  { %v1092_v61 = vpop.permute.xlu1 %1091 }
0x1c3e   :  { %v1094_v62 = vmul.f32 %v2025_v58, %v1092_v61 }
0x1c40   :  { %1096 = vrot.lane.b32.xlu0 %v1094_v62, %s2078_s0 }
0x1cb2   :  { %v1097_v3 = vpop.permute.xlu0 %1096 }
0x1cb3   :  { %v1099_v4 = vadd.f32 %v1097_v3, %v853_v51 }
0x1cb5   :  { %2026 = vtanh.f32 %v1099_v4 }
0x1cbf   :  { %v2027_v5 = vpop.eup %2026 }
0x1cc0   :  { %1103 = vrot.lane.b32.xlu1 %v2027_v5, %s2076_s24 }
0x1d32   :  { %v1104_v1 = vpop.permute.xlu1 %1103 }
0x1d33   :  { %v1106_v11 = vmul.f32 %v1104_v1, %v1101_v14 }
0x1d35   :  { %v1111_v15 = vadd.f32 %v1110_v7, %v1106_v11 }
0x1d37   :  { %v2362_v16 = vpack.c.bf16 %v1111_v15, %v1111_v15  ;;  %v1194_v2 = vrot.slane %v1111_v15, 4 }
0x1d39   :  { %1119 = vrot.lane.b32.xlu0 %v2362_v16, %s2076_s24 }
0x1dab   :  { %v1120_v17 = vpop.permute.xlu0 %1119 }
0x1dac   :  { %1902 = vmatmul.mubr.msk.bf16.vlgmr.msra.gmra.mrb[24].mxu1 %vm111_vm4, %v1120_v17 }
0x1dad   :  { %1914 = vmatpush3.bf16.msra.mxu1 %v2269_v54  ;;  %1917 = vmatprep.mubr.msk.bf16.mxu1 %vm2075_vm2, %v2074_v0 }
0x1dae   :  { %1915 = vmatprep.subr.bf16.mxu1 %v2074_v0 }
0x1db1   :  { %1916 = vmatpush3.bf16.msra.mxu1 %v2279_v37 }
0x1db2   :  { %1929 = vmatprep.subr.bf16.mxu1 %v2074_v0 }
0x1e7f   :  { %v1158_v18 = vpop.f32.mrb[24].mxu1 }
0x1e80   :  { %v1174_v19 = vadd.f32 %v1158_v18, %v2311_v55  ;;  %v1903_v20 = vpop.f32.mrb[25].mxu1  ;;  %v1165_v23 = vrot.slane %v1158_v18, 4 }
0x1e81   :  { %v1161_v9 = vpop.f32.mrb[26].mxu1 }
0x1e82   :  { %v1176_v21 = vrot.slane %v1174_v19, 4  ;;  %v1904_v22 = vpop.f32.mrb[27].mxu1  ;;  %v1167_v24 = vadd.f32 %v1165_v23, %v853_v51 }
0x1e84   :  { %1177 = vrot.lane.b32.xlu1 %v1176_v21, %s2078_s0  ;;  %v1718_v25 = vmul.f32 -1.442695, %v1167_v24 }
0x1e86   :  { %2028 = vpow2.f32 %v1718_v25 }
0x1e90   :  { %v2029_v13 = vpop.eup %2028 }
0x1e91   :  { %v1171_v26 = vadd.f32 1.0, %v2029_v13 }
0x1e93   :  { %2030 = vrcp.f32 %v1171_v26 }
0x1e9d   :  { %v2031_v27 = vpop.eup %2030 }
0x1e9e   :  { %v1187_v33 = vsub.f32 1.0, %v2031_v27  ;;  %v1196_v35 = vmul.f32 %v2031_v27, %v1194_v2 }
0x1ef6   :  { %v1178_v28 = vpop.permute.xlu1 %1177 }
0x1ef7   :  { %v1180_v30 = vmul.f32 %v2031_v27, %v1178_v28 }
0x1ef9   :  { %1182 = vrot.lane.b32.xlu0 %v1180_v30, %s2078_s0 }
0x1f6b   :  { %v1183_v31 = vpop.permute.xlu0 %1182 }
0x1f6c   :  { %v1185_v12 = vadd.f32 %v1183_v31, %v853_v51 }
0x1f6e   :  { %2032 = vtanh.f32 %v1185_v12 }
0x1f78   :  { %v2033_v32 = vpop.eup %2032 }
0x1f79   :  { %1189 = vrot.lane.b32.xlu1 %v2033_v32, %s2076_s24 }
0x1feb   :  { %v1190_v34 = vpop.permute.xlu1 %1189 }
0x1fec   :  { %v1192_v60 = vmul.f32 %v1190_v34, %v1187_v33 }
0x1fee   :  { %v1197_v36 = vadd.f32 %v1196_v35, %v1192_v60 }
0x1ff0   :  { %v2377_v6 = vpack.c.bf16 %v1197_v36, %v1197_v36  ;;  %v1277_v58 = vrot.slane %v1197_v36, 4  ;;  %v861_v36 = vadd.f32 %v2326_v63, %v2303_v45 }
0x1ff2   :  { %v1205_v38 = vrot.slane %v2377_v6, 2 }
0x1ff4   :  { %1206 = vrot.lane.b32.xlu0 %v1205_v38, %s2076_s24 }
0x2066   :  { %v1207_v29 = vpop.permute.xlu0 %1206 }
0x2067   :  { %1910 = vmatmul.mubr.msk.bf16.vlgmr.msra.gmra.mrb[28].mxu0 %vm111_vm4, %v1207_v29 }
0x2068   :  { %1922 = vmatpush3.bf16.msra.mxu0 %v2269_v54  ;;  %1925 = vmatprep.mubr.msk.bf16.mxu0 %vm2075_vm2, %v2074_v0 }
0x2069   :  { %1923 = vmatprep.subr.bf16.mxu0 %v2074_v0 }
0x206c   :  { %1924 = vmatpush3.bf16.msra.mxu0 %v2279_v37 }
0x213a   :  { %v1245_v39 = vpop.f32.mrb[28].mxu0 }
0x213b   :  { %v1258_v40 = vadd.f32 %v1245_v39, %v2311_v55  ;;  %v1911_v8 = vpop.f32.mrb[29].mxu0  ;;  %v1251_v46 = vadd.f32 %v1245_v39, %v858_v44 }
0x213c   :  { %v1248_v41 = vpop.f32.mrb[30].mxu0 }
0x213d   :  { %1260 = vrot.lane.b32.xlu1 %v1258_v40, %s2078_s0  ;;  %v1912_v43 = vpop.f32.mrb[31].mxu0  ;;  %v1720_v47 = vmul.f32 -1.442695, %v1251_v46 }
0x213f   :  { %2034 = vpow2.f32 %v1720_v47 }
0x2149   :  { %v2035_v48 = vpop.eup %2034 }
0x214a   :  { %v1255_v49 = vadd.f32 1.0, %v2035_v48 }
0x214c   :  { %2036 = vrcp.f32 %v1255_v49 }
0x2156   :  { %v2037_v50 = vpop.eup %2036 }
0x2157   :  { %v1270_v61 = vsub.f32 1.0, %v2037_v50  ;;  %v1279_v62 = vmul.f32 %v2037_v50, %v1277_v58 }
0x21af   :  { %v1261_v51 = vpop.permute.xlu1 %1260 }
0x21b0   :  { %v1263_v52 = vmul.f32 %v2037_v50, %v1261_v51 }
0x21b2   :  { %1265 = vrot.lane.b32.xlu0 %v1263_v52, %s2078_s0 }
0x2224   :  { %v1266_v53 = vpop.permute.xlu0 %1265 }
0x2225   :  { %v1268_v56 = vadd.f32 %v1266_v53, %v858_v44 }
0x2227   :  { %2038 = vtanh.f32 %v1268_v56 }
0x2231   :  { %v2039_v57 = vpop.eup %2038 }
0x2232   :  { %1272 = vrot.lane.b32.xlu1 %v2039_v57, %s2076_s24 }
0x22a4   :  { %v1273_v59 = vpop.permute.xlu1 %1272 }
0x22a5   :  { %v1275_v3 = vmul.f32 %v1273_v59, %v1270_v61 }
0x22a7   :  { %v1280_v4 = vadd.f32 %v1279_v62, %v1275_v3 }
0x22a9   :  { %v1281_v5 = vpack.c.bf16 %v1280_v4, %v1280_v4  ;;  %v1360_v25 = vrot.slane %v1280_v4, 4 }
0x22ab   :  { %1283 = vrot.lane.b32.xlu0 %v1281_v5, %s2076_s24 }
0x231d   :  { %v1284_v10 = vpop.permute.xlu0 %1283 }
0x231e   :  { %1286 = vst.msk [vmem:[#allocation2 + $0x8] sm:$0x3] %vm191_vm3, %v1284_v10  ;;  %1918 = vmatmul.mubr.msk.bf16.vlgmr.msra.gmra.mrb[28].mxu1 %vm111_vm4, %v1284_v10 }
0x231f   :  { %1930 = vmatpush3.bf16.msra.mxu1 %v2269_v54  ;;  %1933 = vmatprep.mubr.msk.bf16.mxu1 %vm2075_vm2, %v2074_v0 }
0x2320   :  { %1931 = vmatprep.subr.bf16.mxu1 %v2074_v0 }
0x2323   :  { %1932 = vmatpush3.bf16.msra.mxu1 %v2279_v37 }
0x23f1   :  { %v1324_v14 = vpop.f32.mrb[28].mxu1 }
0x23f2   :  { %v1340_v1 = vadd.f32 %v1324_v14, %v2311_v55  ;;  %v1919_v7 = vpop.f32.mrb[29].mxu1  ;;  %v1331_v18 = vrot.slane %v1324_v14, 4 }
0x23f3   :  { %v1327_v11 = vpop.f32.mrb[30].mxu1 }
0x23f4   :  { %v1342_v15 = vrot.slane %v1340_v1, 4  ;;  %v1920_v17 = vpop.f32.mrb[31].mxu1  ;;  %v1333_v19 = vadd.f32 %v1331_v18, %v858_v44 }
0x23f6   :  { %1343 = vrot.lane.b32.xlu1 %v1342_v15, %s2078_s0  ;;  %v1722_v20 = vmul.f32 -1.442695, %v1333_v19 }
0x23f8   :  { %2040 = vpow2.f32 %v1722_v20 }
0x2402   :  { %v2041_v54 = vpop.eup %2040 }
0x2403   :  { %v1337_v9 = vadd.f32 1.0, %v2041_v54 }
0x2405   :  { %2042 = vrcp.f32 %v1337_v9 }
0x240f   :  { %v2043_v21 = vpop.eup %2042 }
0x2410   :  { %v1353_v13 = vsub.f32 1.0, %v2043_v21  ;;  %v1362_v27 = vmul.f32 %v2043_v21, %v1360_v25 }
0x2468   :  { %v1344_v0 = vpop.permute.xlu1 %1343 }
0x2469   :  { %v1346_v22 = vmul.f32 %v2043_v21, %v1344_v0  ;;  %v1961_v21 = vld [vmem:[%s2477_s1 + $0x48] sm:$0xff]  }
0x246b   :  { %1348 = vrot.lane.b32.xlu0 %v1346_v22, %s2078_s0 }
0x24dd   :  { %v1349_v37 = vpop.permute.xlu0 %1348 }
0x24de   :  { %v1351_v23 = vadd.f32 %v1349_v37, %v858_v44 }
0x24e0   :  { %2044 = vtanh.f32 %v1351_v23 }
0x24ea   :  { %v2045_v24 = vpop.eup %2044 }
0x24eb   :  { %1355 = vrot.lane.b32.xlu1 %v2045_v24, %s2076_s24 }
0x255d   :  { %v1356_v26 = vpop.permute.xlu1 %1355 }
0x255e   :  { %v1358_v28 = vmul.f32 %v1356_v26, %v1353_v13 }
0x2560   :  { %v1363_v30 = vadd.f32 %v1362_v27, %v1358_v28 }
0x2562   :  { %v2405_v31 = vpack.c.bf16 %v1363_v30, %v1363_v30  ;;  %v1442_v48 = vrot.slane %v1363_v30, 4 }
0x2564   :  { %v1370_v12 = vrot.slane %v2405_v31, 2 }
0x2566   :  { %1371 = vrot.lane.b32.xlu0 %v1370_v12, %s2076_s24  ;;  %v1727_v12 = vld [vmem:[%s2479_s2 + $0x2] ss:$0 sm:$0xff] }
0x25d8   :  { %v1372_v32 = vpop.permute.xlu0 %1371 }
0x25d9   :  { %1926 = vmatmul.mubr.msk.bf16.vlgmr.msra.gmra.mrb[32].mxu0 %vm111_vm4, %v1372_v32 }
0x26ac   :  { %v1410_v2 = vpop.f32.mrb[32].mxu0 }
0x26ad   :  { %v1423_v33 = vadd.f32 %v1410_v2, %v2311_v55  ;;  %v1927_v34 = vpop.f32.mrb[33].mxu0  ;;  %v1416_v38 = vadd.f32 %v1410_v2, %v861_v36 }
0x26ae   :  { %v1413_v35 = vpop.f32.mrb[34].mxu0 }
0x26af   :  { %1425 = vrot.lane.b32.xlu1 %v1423_v33, %s2078_s0  ;;  %v1928_v60 = vpop.f32.mrb[35].mxu0  ;;  %v1724_v29 = vmul.f32 -1.442695, %v1416_v38 }
0x26b1   :  { %2046 = vpow2.f32 %v1724_v29 }
0x26bb   :  { %v2047_v39 = vpop.eup %2046 }
0x26bc   :  { %v1420_v40 = vadd.f32 1.0, %v2047_v39 }
0x26be   :  { %2048 = vrcp.f32 %v1420_v40 }
0x26c8   :  { %v2049_v8 = vpop.eup %2048 }
0x26c9   :  { %v1435_v49 = vsub.f32 1.0, %v2049_v8  ;;  %v1444_v63 = vmul.f32 %v2049_v8, %v1442_v48 }
0x2721   :  { %v1426_v41 = vpop.permute.xlu1 %1425 }
0x2722   :  { %v1428_v43 = vmul.f32 %v2049_v8, %v1426_v41 }
0x2724   :  { %1430 = vrot.lane.b32.xlu0 %v1428_v43, %s2078_s0 }
0x2796   :  { %v1431_v44 = vpop.permute.xlu0 %1430 }
0x2797   :  { %v1433_v46 = vadd.f32 %v1431_v44, %v861_v36 }
0x2799   :  { %2050 = vtanh.f32 %v1433_v46 }
0x27a3   :  { %v2051_v47 = vpop.eup %2050 }
0x27a4   :  { %1437 = vrot.lane.b32.xlu1 %v2051_v47, %s2076_s24 }
0x2816   :  { %v1438_v45 = vpop.permute.xlu1 %1437 }
0x2817   :  { %v1440_v50 = vmul.f32 %v1438_v45, %v1435_v49 }
0x2819   :  { %v1445_v51 = vadd.f32 %v1444_v63, %v1440_v50 }
0x281b   :  { %v1446_v52 = vpack.c.bf16 %v1445_v51, %v1445_v51  ;;  %v1528_v0 = vrot.slane %v1445_v51, 4 }
0x281d   :  { %1453 = vrot.lane.b32.xlu0 %v1446_v52, %s2076_s24  ;;  %v1448_v15 = vrot.slane %v1446_v52, 4 }
0x288f   :  { %v1454_v53 = vpop.permute.xlu0 %1453 }
0x2890   :  { %1934 = vmatmul.mubr.msk.bf16.vlgmr.msra.gmra.mrb[32].mxu1 %vm111_vm4, %v1454_v53 }
0x2963   :  { %v1492_v56 = vpop.f32.mrb[32].mxu1 }
0x2964   :  { %v1508_v57 = vadd.f32 %v1492_v56, %v2311_v55  ;;  %v1935_v58 = vpop.f32.mrb[33].mxu1  ;;  %v1499_v3 = vrot.slane %v1492_v56, 4  ;;  %v1200_v55 = vrot.slane %v2377_v6, 4  ;;  %v1114_v6 = vrot.slane %v2362_v16, 4 }
0x2965   :  { %v1495_v61 = vpop.f32.mrb[34].mxu1 }
0x2966   :  { %v1510_v59 = vrot.slane %v1508_v57, 4  ;;  %v1936_v62 = vpop.f32.mrb[35].mxu1  ;;  %v1501_v4 = vadd.f32 %v1499_v3, %v861_v36 }
0x2968   :  { %1511 = vrot.lane.b32.xlu1 %v1510_v59, %s2078_s0  ;;  %v1726_v5 = vmul.f32 -1.442695, %v1501_v4 }
0x296a   :  { %2052 = vpow2.f32 %v1726_v5 }
0x2974   :  { %v2053_v10 = vpop.eup %2052 }
0x2975   :  { %v1505_v14 = vadd.f32 1.0, %v2053_v10 }
0x2977   :  { %2054 = vrcp.f32 %v1505_v14 }
0x2981   :  { %v2055_v1 = vpop.eup %2054 }
0x2982   :  { %v1521_v22 = vsub.f32 1.0, %v2055_v1  ;;  %v1530_v23 = vmul.f32 %v2055_v1, %v1528_v0 }
0x29da   :  { %v1512_v7 = vpop.permute.xlu1 %1511 }
0x29db   :  { %v1514_v11 = vmul.f32 %v2055_v1, %v1512_v7 }
0x29dd   :  { %1516 = vrot.lane.b32.xlu0 %v1514_v11, %s2078_s0 }
0x29e1   :  { %1032 = vrot.lane.b32.xlu0 %v2345_v42, %s2076_s24  ;;  %v1960_v42 = vld [vmem:[%s2477_s1 + $0x40] sm:$0xff]  }
0x29e2   :  { %1937 = vmatprep.subr.bf16.mxu0 %v1960_v42 }
0x29e3   :  { %1938 = vmatpush3.bf16.msra.mxu0 %v1960_v42 }
0x29e4   :  { %1939 = vmatprep.subr.bf16.mxu0 %v1961_v21 }
0x29e5   :  { %1201 = vrot.lane.b32.xlu0 %v1200_v55, %s2076_s24 }
0x29e7   :  { %1940 = vmatpush3.bf16.msra.mxu0 %v1961_v21 }
0x29e9   :  { %1449 = vrot.lane.b32.xlu0 %v1448_v15, %s2076_s24 }
0x2a4f   :  { %v1517_v17 = vpop.permute.xlu0 %1516 }
0x2a50   :  { %v1519_v18 = vadd.f32 %v1517_v17, %v861_v36 }
0x2a52   :  { %2056 = vtanh.f32 %v1519_v18 }
0x2a53   :  { %v1033_v19 = vpop.permute.xlu0 %1032 }
0x2a54   :  { %1035 = vst.msk [vmem:[#allocation2] sm:$0xc] %vm275_vm5, %v1033_v19 }
0x2a57   :  { %v1202_v20 = vpop.permute.xlu0 %1201 }
0x2a58   :  { %1204 = vst.msk [vmem:[#allocation2] sm:$0xc0] %vm446_vm6, %v1202_v20 }
0x2a5b   :  { %v1450_v54 = vpop.permute.xlu0 %1449 }
0x2a5c   :  { %v2057_v9 = vpop.eup %2056  ;;  %1452 = vst.msk [vmem:[#allocation2 + $0x8] sm:$0x30] %vm359_vm7, %v1450_v54 }
0x2a5d   :  { %1523 = vrot.lane.b32.xlu1 %v2057_v9, %s2076_s24 }
0x2a61   :  { %1115 = vrot.lane.b32.xlu1 %v1114_v6, %s2076_s24 }
0x2a65   :  { %1366 = vrot.lane.b32.xlu1 %v2405_v31, %s2076_s24 }
0x2acf   :  { %v1524_v37 = vpop.permute.xlu1 %1523 }
0x2ad0   :  { %v1526_v24 = vmul.f32 %v1524_v37, %v1521_v22 }
0x2ad2   :  { %v1531_v25 = vadd.f32 %v1530_v23, %v1526_v24 }
0x2ad3   :  { %v1116_v13 = vpop.permute.xlu1 %1115 }
0x2ad4   :  { %v1532_v16 = vpack.c.bf16 %v1531_v25, %v1531_v25  ;;  %1118 = vst.msk [vmem:[#allocation2] sm:$0x30] %vm359_vm7, %v1116_v13 }
0x2ad6   :  { %v1534_v26 = vrot.slane %v1532_v16, 4 }
0x2ad7   :  { %v1367_v27 = vpop.permute.xlu1 %1366 }
0x2ad8   :  { %1369 = vst.msk [vmem:[#allocation2 + $0x8] sm:$0xc] %vm275_vm5, %v1367_v27  ;;  %1535 = vrot.lane.b32.xlu1 %v1534_v26, %s2076_s24 }
0x2adb   :  { %v1544_v28 = vld [vmem:[#allocation2] sm:$0xff] }
0x2adc   :  { %1941 = vmatprep.mubr.msk.bf16.mxu0 %vm111_vm4, %v1544_v28 }
0x2b4a   :  { %v1536_v30 = vpop.permute.xlu1 %1535 }
0x2b4b   :  { %1538 = vst.msk [vmem:[#allocation2 + $0x8] sm:$0xc0] %vm446_vm6, %v1536_v30 }
0x2b52   :  { %v1545_v31 = vld [vmem:[#allocation2 + $0x8] sm:$0xff] }
0x2b53   :  { %1942 = vmatmul.mubr.msk.bf16.vlgmr.msra.gmra.mrb[36].mxu0 %vm111_vm4, %v1545_v31 }
0x2c26   :  { %v1943_v32 = vpop.f32.mrb[36].mxu0 }
0x2c27   :  { %v1611_v2 = vadd.f32 %v1943_v32, %v1727_v12  ;;  %v1602_v33 = vpop.f32.mrb[37].mxu0 }
0x2c28   :  { %v1603_v34 = vadd.f32 %v1727_v12, %v1602_v33  ;;  %v1944_v35 = vpop.f32.mrb[38].mxu0 }
0x2c29   :  { %v1734_v60 = vmul.f32 -1.442695, %v1611_v2  ;;  %v1614_v36 = vadd.f32 %v1944_v35, %v1727_v12  ;;  %v1605_v38 = vpop.f32.mrb[39].mxu0 }
0x2c2a   :  { %v1732_v29 = vmul.f32 -1.442695, %v1603_v34  ;;  %v1606_v39 = vadd.f32 %v1727_v12, %v1605_v38 }
0x2c2b   :  { %2058 = vpow2.f32 %v1734_v60  ;;  %v1735_v40 = vmul.f32 -1.442695, %v1614_v36 }
0x2c2c   :  { %2060 = vpow2.f32 %v1732_v29  ;;  %v1733_v8 = vmul.f32 -1.442695, %v1606_v39 }
0x2c2d   :  { %2062 = vpow2.f32 %v1735_v40 }
0x2c2e   :  { %2064 = vpow2.f32 %v1733_v8 }
0x2c35   :  { %v2059_v41 = vpop.eup %2058 }
0x2c36   :  { %v2061_v43 = vpop.eup %2060  ;;  %v1631_v44 = vadd.f32 1.0, %v2059_v41 }
0x2c37   :  { %v2063_v46 = vpop.eup %2062  ;;  %v1629_v47 = vadd.f32 1.0, %v2061_v43 }
0x2c38   :  { %v2065_v48 = vpop.eup %2064  ;;  %2066 = vrcp.f32 %v1631_v44  ;;  %v1632_v49 = vadd.f32 1.0, %v2063_v46 }
0x2c39   :  { %2068 = vrcp.f32 %v1629_v47  ;;  %v1630_v45 = vadd.f32 1.0, %v2065_v48 }
0x2c3a   :  { %2070 = vrcp.f32 %v1632_v49 }
0x2c3b   :  { %2072 = vrcp.f32 %v1630_v45 }
0x2c42   :  { %v2067_v63 = vpop.eup %2066 }
0x2c43   :  { %v2069_v50 = vpop.eup %2068  ;;  %v1664_v51 = vcombine.high %v2067_v63, %v2067_v63  ;;  %1662 = vst.msk [vmem:[%s2480_s3 + $0x4] sm:$0xf] %vm1641_vm8, %v2067_v63 }
0x2c44   :  { %v1644_v52 = vcombine.high %v2069_v50, %v2069_v50  ;;  %1642 = vst.msk [vmem:[%s2480_s3] sm:$0xf] %vm1641_vm8, %v2069_v50  ;;  %v2071_v53 = vpop.eup %2070 }
0x2c45   :  { %1665 = vrot.lane.b32.xlu1 %v1664_v51, %s2079_s16  ;;  %v2073_v56 = vpop.eup %2072  ;;  %v1674_v57 = vcombine.high %v2071_v53, %v2071_v53 }
0x2c46   :  { %1645 = vrot.lane.b32.xlu0 %v1644_v52, %s2079_s16  ;;  %v1656_v58 = vcombine.high %v2073_v56, %v2073_v56 }
0x2c49   :  { %1670 = vrot.lane.b32.xlu1 %v2071_v53, %s2078_s0 }
0x2c4a   :  { %1651 = vrot.lane.b32.xlu0 %v2073_v56, %s2078_s0 }
0x2c4d   :  { %1675 = vrot.lane.b32.xlu1 %v1674_v57, %s2076_s24 }
0x2c4e   :  { %1657 = vrot.lane.b32.xlu0 %v1656_v58, %s2076_s24 }
0x2cb7   :  { %v1666_v61 = vpop.permute.xlu1 %1665 }
0x2cb8   :  { %1668 = vst.msk [vmem:[%s2480_s3 + $0x4] sm:$0xf] %vm1648_vm9, %v1666_v61  ;;  %v1646_v59 = vpop.permute.xlu0 %1645 }
0x2cb9   :  { %1649 = vst.msk [vmem:[%s2480_s3] sm:$0xf] %vm1648_vm9, %v1646_v59 }
0x2cbb   :  { %v1671_v62 = vpop.permute.xlu1 %1670 }
0x2cbc   :  { %1673 = vst.msk [vmem:[%s2480_s3 + $0x4] sm:$0xf] %vm1654_vm10, %v1671_v62  ;;  %v1652_v3 = vpop.permute.xlu0 %1651 }
0x2cbd   :  { %1655 = vst.msk [vmem:[%s2480_s3] sm:$0xf] %vm1654_vm10, %v1652_v3 }
0x2cbf   :  { %v1676_v4 = vpop.permute.xlu1 %1675 }
0x2cc0   :  { %1678 = vst.msk [vmem:[%s2480_s3 + $0x4] sm:$0xf] %vm1660_vm11, %v1676_v4  ;;  %v1658_v5 = vpop.permute.xlu0 %1657 }
0x2cc1   :  { %1661 = vst.msk [vmem:[%s2480_s3] sm:$0xf] %vm1660_vm11, %v1658_v5 }

</bundles_post_ra>
